<compile_context>
chip_gen: v7x
topology: tpu7x:2x2x1
jax: 0.10.0
libtpu: 0.0.40
codegen_flags: <defaults>
</compile_context>

<pallas_src>
import jax
import jax.numpy as jnp
from jax.experimental import pallas as pl
from jax.experimental.pallas import tpu as pltpu


def _make_kernel(layer_out_dims, bias_offsets, n_enc):
    """Build the feature-major autoencoder kernel as a closure over the static
    layer geometry (output widths + bias-slab offsets)."""
    n_layers = len(layer_out_dims)

    def kernel(x_ref, b_ref, *refs):
        w_refs = refs[:n_layers]
        z_ref, xhat_ref = refs[n_layers], refs[n_layers + 1]

        # (x_dim, TB) bf16 — lane-dense load (TB is a multiple of 128).
        h = x_ref[...]

        for l in range(n_layers):
            out = layer_out_dims[l]
            off = bias_offsets[l]
            b = b_ref[off:off + out, :]          # (out, 1) f32, static 8-aligned slice

            # bf16 operands, f32 accumulation on the MXU; bias add in f32.
            y = jnp.dot(w_refs[l][...], h, preferred_element_type=jnp.float32) + b

            if l == n_enc - 1:
                # Final encoder layer: no ReLU; lane-dense (z_dim, TB) store.
                z_ref[...] = y.astype(z_ref.dtype)
            elif l == n_layers - 1:
                # Final decoder layer: no ReLU; lane-dense (x_dim, TB) store.
                xhat_ref[...] = y.astype(xhat_ref.dtype)
            else:
                y = jnp.maximum(y, 0.0)          # ReLU in f32 (v5e-safe)

            if l < n_layers - 1:
                h = y.astype(jnp.bfloat16)       # bf16 carry into the next matmul

    return kernel


def autoencoder_forward(x, weights, biases, *, tb=1024, n_enc=4):
    """x: (B, x_dim) f32.
    weights: list of 8 arrays in PyTorch layout (out, in); biases: list of 8 (out,)."""
    B, x_dim = x.shape
    n_layers = len(weights)
    layer_out_dims = tuple(int(w.shape[0]) for w in weights)
    z_dim = layer_out_dims[n_enc - 1]

    # bf16 weights once (MXU operands); biases stay f32.
    weights_bf16 = [w.astype(jnp.bfloat16) for w in weights]

    # Pack all biases into one sublane-aligned (total, 1) f32 slab: one operand
    # instead of eight, sliced in-kernel at static 8-aligned offsets.
    seg = [-(-d // 8) * 8 for d in layer_out_dims]
    bias_offsets = [0]
    for s in seg[:-1]:
        bias_offsets.append(bias_offsets[-1] + s)
    bias_offsets = tuple(bias_offsets)
    total = sum(seg)
    b_all = jnp.zeros((total, 1), jnp.float32)
    for off, b in zip(bias_offsets, biases):
        b_all = b_all.at[off:off + b.shape[0], 0].set(b.astype(jnp.float32))

    # Effective batch tile: big (amortizes ~0.35us/step overhead, feeds the MXU
    # a wide lane-dense N), a multiple of 128, and >= 2 grid steps when possible
    # so v7x's two TensorCores both get work.
    tb_eff = min(int(tb), max(128, 128 * pl.cdiv(pl.cdiv(B, 2), 128)))
    n_tiles = pl.cdiv(B, tb_eff)
    B_pad = n_tiles * tb_eff

    # Feature-major, bf16 input; pad batch (lanes) up to the tile multiple.
    x_t = x.T.astype(jnp.bfloat16)
    if B_pad != B:
        x_t = jnp.pad(x_t, ((0, 0), (0, B_pad - B)))

    x_spec = pl.BlockSpec((x_dim, tb_eff), lambda i: (0, i))
    b_spec = pl.BlockSpec(b_all.shape, lambda i: (0, 0))
    w_specs = [pl.BlockSpec(w.shape, lambda i: (0, 0)) for w in weights_bf16]
    z_spec = pl.BlockSpec((z_dim, tb_eff), lambda i: (0, i))
    xhat_spec = pl.BlockSpec((x_dim, tb_eff), lambda i: (0, i))

    # Advisory cost estimate for the XLA scheduler.
    macs_per_col = sum(int(w.shape[0]) * int(w.shape[1]) for w in weights)
    param_bytes = sum(int(w.size) * 2 for w in weights_bf16) + int(b_all.size) * 4
    cost = pl.CostEstimate(
        flops=2 * macs_per_col * B_pad,
        transcendentals=0,
        bytes_accessed=B_pad * (2 * x_dim + 4 * (x_dim + z_dim)) + param_bytes,
    )

    kernel = _make_kernel(layer_out_dims, bias_offsets, n_enc)

    z_t, xhat_t = pl.pallas_call(
        kernel,
        out_shape=(
            jax.ShapeDtypeStruct((z_dim, B_pad), jnp.float32),
            jax.ShapeDtypeStruct((x_dim, B_pad), jnp.float32),
        ),
        grid=(n_tiles,),
        in_specs=[x_spec, b_spec] + w_specs,
        out_specs=(z_spec, xhat_spec),
        compiler_params=pltpu.CompilerParams(
            dimension_semantics=("parallel",),
        ),
        cost_estimate=cost,
    )(x_t, b_all, *weights_bf16)

    # Layout plumbing back to PyTorch's (B, feat) convention.
    z = z_t[:, :B].T
    x_hat = xhat_t[:, :B].T
    return z, x_hat


def init_params(key, x_dim, z_dim):
    """Deterministic synthetic init, PyTorch nn.Linear layout: W (out, in), b (out,)."""
    enc_dims = [(x_dim, 40), (40, 30), (30, 20), (20, z_dim)]
    dec_dims = [(z_dim, 20), (20, 30), (30, 40), (40, x_dim)]
    weights, biases = [], []
    keys = jax.random.split(key, len(enc_dims) + len(dec_dims))
    for k, (fin, fout) in zip(keys, enc_dims + dec_dims):
        kw, kb = jax.random.split(k)
        bound = 1.0 / (fin ** 0.5)  # PyTorch nn.Linear default init range
        w = jax.random.uniform(kw, (fout, fin), jnp.float32, -bound, bound)
        b = jax.random.uniform(kb, (fout,), jnp.float32, -bound, bound)
        weights.append(w)
        biases.append(b)
    return weights, biases


def reference_forward(x, weights, biases, n_enc=4):
    """Pure-JAX reference mirroring the kernel numerics (feature-major,
    bf16 matmul operands / f32 accumulation, bf16 activation carry)."""
    n_layers = len(weights)
    h = x.T.astype(jnp.bfloat16)
    z = x_hat = None
    for l, (w, b) in enumerate(zip(weights, biases)):
        y = jnp.dot(
            w.astype(jnp.bfloat16), h, preferred_element_type=jnp.float32
        ) + b[:, None]
        if l == n_enc - 1:
            z = y
        elif l == n_layers - 1:
            x_hat = y
        else:
            y = jnp.maximum(y, 0.0)
        if l < n_layers - 1:
            h = y.astype(jnp.bfloat16)
    return z.T, x_hat.T


if __name__ == "__main__":
    x_dim, z_dim, batch = 16, 8, 2048   # 2 grid steps of TB=1024 (feeds both v7x TCs)

    key = jax.random.PRNGKey(0)
    k_x, k_p = jax.random.split(key)
    x = jax.random.normal(k_x, (batch, x_dim), jnp.float32)
    weights, biases = init_params(k_p, x_dim, z_dim)

    fwd = jax.jit(autoencoder_forward)
    z, x_hat = fwd(x, weights, biases)
    jax.block_until_ready((z, x_hat))

    z_ref, x_hat_ref = reference_forward(x, weights, biases)
    assert z.shape == (batch, z_dim) and x_hat.shape == (batch, x_dim)
    assert jnp.allclose(z, z_ref, atol=1e-2, rtol=1e-2)
    assert jnp.allclose(x_hat, x_hat_ref, atol=1e-2, rtol=1e-2)

    print("KERNEL_OK")
</pallas_src>

<mosaic_0001>
module attributes {stable_mosaic.version = 11 : i64} {
  func.func @kernel(%arg0: i32, %arg1: memref<16x1024xbf16, #tpu.memory_space<vmem>>, %arg2: memref<216x1xf32, #tpu.memory_space<vmem>>, %arg3: memref<40x16xbf16, #tpu.memory_space<vmem>>, %arg4: memref<30x40xbf16, #tpu.memory_space<vmem>>, %arg5: memref<20x30xbf16, #tpu.memory_space<vmem>>, %arg6: memref<8x20xbf16, #tpu.memory_space<vmem>>, %arg7: memref<20x8xbf16, #tpu.memory_space<vmem>>, %arg8: memref<30x20xbf16, #tpu.memory_space<vmem>>, %arg9: memref<40x30xbf16, #tpu.memory_space<vmem>>, %arg10: memref<16x40xbf16, #tpu.memory_space<vmem>>, %arg11: memref<8x1024xf32, #tpu.memory_space<vmem>>, %arg12: memref<16x1024xf32, #tpu.memory_space<vmem>>) attributes {dimension_semantics = [#tpu.dimension_semantics<parallel>], iteration_bounds = array<i64: 2>, scalar_prefetch = 0 : i64, scratch_operands = 0 : i64, tpu.core_type = #tpu.core_type<tc>, window_params = [{transform_indices = @transform_0, window_bounds = array<i64: 16, 1024>}, {pipeline_mode = #tpu.pipeline_mode<synchronous>, transform_indices = @transform_1, window_bounds = array<i64: 216, 1>}, {pipeline_mode = #tpu.pipeline_mode<synchronous>, transform_indices = @transform_2, window_bounds = array<i64: 40, 16>}, {pipeline_mode = #tpu.pipeline_mode<synchronous>, transform_indices = @transform_3, window_bounds = array<i64: 30, 40>}, {pipeline_mode = #tpu.pipeline_mode<synchronous>, transform_indices = @transform_4, window_bounds = array<i64: 20, 30>}, {pipeline_mode = #tpu.pipeline_mode<synchronous>, transform_indices = @transform_5, window_bounds = array<i64: 8, 20>}, {pipeline_mode = #tpu.pipeline_mode<synchronous>, transform_indices = @transform_6, window_bounds = array<i64: 20, 8>}, {pipeline_mode = #tpu.pipeline_mode<synchronous>, transform_indices = @transform_7, window_bounds = array<i64: 30, 20>}, {pipeline_mode = #tpu.pipeline_mode<synchronous>, transform_indices = @transform_8, window_bounds = array<i64: 40, 30>}, {pipeline_mode = #tpu.pipeline_mode<synchronous>, transform_indices = @transform_9, window_bounds = array<i64: 16, 40>}, {transform_indices = @transform_10, window_bounds = array<i64: 8, 1024>}, {transform_indices = @transform_11, window_bounds = array<i64: 16, 1024>}]} {
    %c0 = arith.constant 0 : index
    %c0_0 = arith.constant 0 : index
    %0 = vector.load %arg1[%c0, %c0_0] : memref<16x1024xbf16, #tpu.memory_space<vmem>>, vector<16x1024xbf16>
    %c0_1 = arith.constant 0 : index
    %c0_2 = arith.constant 0 : index
    %1 = vector.load %arg2[%c0_1, %c0_2] : memref<216x1xf32, #tpu.memory_space<vmem>>, vector<40x1xf32>
    %c0_3 = arith.constant 0 : index
    %c0_4 = arith.constant 0 : index
    %2 = vector.load %arg3[%c0_3, %c0_4] : memref<40x16xbf16, #tpu.memory_space<vmem>>, vector<40x16xbf16>
    %cst = arith.constant dense<0.000000e+00> : vector<40x1024xf32>
    %3 = tpu.matmul %2, %0, %cst {dimension_numbers = #tpu.dot_dimension_numbers<[1], [0], [0], [1], [0, 0, 1, 1], [], []>} : vector<40x16xbf16>, vector<16x1024xbf16>, vector<40x1024xf32> -> vector<40x1024xf32>
    %4 = vector.broadcast %1 : vector<40x1xf32> to vector<40x1024xf32>
    %5 = arith.addf %3, %4 : vector<40x1024xf32>
    %cst_5 = arith.constant 0.000000e+00 : f32
    %6 = vector.broadcast %cst_5 : f32 to vector<40x1024xf32>
    %7 = arith.maximumf %5, %6 : vector<40x1024xf32>
    %8 = arith.truncf %7 : vector<40x1024xf32> to vector<40x1024xbf16>
    %c40 = arith.constant 40 : index
    %c0_6 = arith.constant 0 : index
    %9 = vector.load %arg2[%c40, %c0_6] : memref<216x1xf32, #tpu.memory_space<vmem>>, vector<30x1xf32>
    %c0_7 = arith.constant 0 : index
    %c0_8 = arith.constant 0 : index
    %10 = vector.load %arg4[%c0_7, %c0_8] : memref<30x40xbf16, #tpu.memory_space<vmem>>, vector<30x40xbf16>
    %cst_9 = arith.constant dense<0.000000e+00> : vector<30x1024xf32>
    %11 = tpu.matmul %10, %8, %cst_9 {dimension_numbers = #tpu.dot_dimension_numbers<[1], [0], [0], [1], [0, 0, 1, 1], [], []>} : vector<30x40xbf16>, vector<40x1024xbf16>, vector<30x1024xf32> -> vector<30x1024xf32>
    %12 = vector.broadcast %9 : vector<30x1xf32> to vector<30x1024xf32>
    %13 = arith.addf %11, %12 : vector<30x1024xf32>
    %cst_10 = arith.constant 0.000000e+00 : f32
    %14 = vector.broadcast %cst_10 : f32 to vector<30x1024xf32>
    %15 = arith.maximumf %13, %14 : vector<30x1024xf32>
    %16 = arith.truncf %15 : vector<30x1024xf32> to vector<30x1024xbf16>
    %c72 = arith.constant 72 : index
    %c0_11 = arith.constant 0 : index
    %17 = vector.load %arg2[%c72, %c0_11] : memref<216x1xf32, #tpu.memory_space<vmem>>, vector<20x1xf32>
    %c0_12 = arith.constant 0 : index
    %c0_13 = arith.constant 0 : index
    %18 = vector.load %arg5[%c0_12, %c0_13] : memref<20x30xbf16, #tpu.memory_space<vmem>>, vector<20x30xbf16>
    %cst_14 = arith.constant dense<0.000000e+00> : vector<20x1024xf32>
    %19 = tpu.matmul %18, %16, %cst_14 {dimension_numbers = #tpu.dot_dimension_numbers<[1], [0], [0], [1], [0, 0, 1, 1], [], []>} : vector<20x30xbf16>, vector<30x1024xbf16>, vector<20x1024xf32> -> vector<20x1024xf32>
    %20 = vector.broadcast %17 : vector<20x1xf32> to vector<20x1024xf32>
    %21 = arith.addf %19, %20 : vector<20x1024xf32>
    %cst_15 = arith.constant 0.000000e+00 : f32
    %22 = vector.broadcast %cst_15 : f32 to vector<20x1024xf32>
    %23 = arith.maximumf %21, %22 : vector<20x1024xf32>
    %24 = arith.truncf %23 : vector<20x1024xf32> to vector<20x1024xbf16>
    %c96 = arith.constant 96 : index
    %c0_16 = arith.constant 0 : index
    %25 = vector.load %arg2[%c96, %c0_16] : memref<216x1xf32, #tpu.memory_space<vmem>>, vector<8x1xf32>
    %c0_17 = arith.constant 0 : index
    %c0_18 = arith.constant 0 : index
    %26 = vector.load %arg6[%c0_17, %c0_18] : memref<8x20xbf16, #tpu.memory_space<vmem>>, vector<8x20xbf16>
    %cst_19 = arith.constant dense<0.000000e+00> : vector<8x1024xf32>
    %27 = tpu.matmul %26, %24, %cst_19 {dimension_numbers = #tpu.dot_dimension_numbers<[1], [0], [0], [1], [0, 0, 1, 1], [], []>} : vector<8x20xbf16>, vector<20x1024xbf16>, vector<8x1024xf32> -> vector<8x1024xf32>
    %28 = vector.broadcast %25 : vector<8x1xf32> to vector<8x1024xf32>
    %29 = arith.addf %27, %28 : vector<8x1024xf32>
    %c0_20 = arith.constant 0 : index
    %c0_21 = arith.constant 0 : index
    %30 = vector.load %arg11[%c0_20, %c0_21] : memref<8x1024xf32, #tpu.memory_space<vmem>>, vector<8x1024xf32>
    tpu.vector_store %arg11[%c0_20, %c0_21], %29 {strides = array<i32>} : memref<8x1024xf32, #tpu.memory_space<vmem>>, vector<8x1024xf32>,
    %31 = arith.truncf %29 : vector<8x1024xf32> to vector<8x1024xbf16>
    %c104 = arith.constant 104 : index
    %c0_22 = arith.constant 0 : index
    %32 = vector.load %arg2[%c104, %c0_22] : memref<216x1xf32, #tpu.memory_space<vmem>>, vector<20x1xf32>
    %c0_23 = arith.constant 0 : index
    %c0_24 = arith.constant 0 : index
    %33 = vector.load %arg7[%c0_23, %c0_24] : memref<20x8xbf16, #tpu.memory_space<vmem>>, vector<20x8xbf16>
    %cst_25 = arith.constant dense<0.000000e+00> : vector<20x1024xf32>
    %34 = tpu.matmul %33, %31, %cst_25 {dimension_numbers = #tpu.dot_dimension_numbers<[1], [0], [0], [1], [0, 0, 1, 1], [], []>} : vector<20x8xbf16>, vector<8x1024xbf16>, vector<20x1024xf32> -> vector<20x1024xf32>
    %35 = vector.broadcast %32 : vector<20x1xf32> to vector<20x1024xf32>
    %36 = arith.addf %34, %35 : vector<20x1024xf32>
    %cst_26 = arith.constant 0.000000e+00 : f32
    %37 = vector.broadcast %cst_26 : f32 to vector<20x1024xf32>
    %38 = arith.maximumf %36, %37 : vector<20x1024xf32>
    %39 = arith.truncf %38 : vector<20x1024xf32> to vector<20x1024xbf16>
    %c128 = arith.constant 128 : index
    %c0_27 = arith.constant 0 : index
    %40 = vector.load %arg2[%c128, %c0_27] : memref<216x1xf32, #tpu.memory_space<vmem>>, vector<30x1xf32>
    %c0_28 = arith.constant 0 : index
    %c0_29 = arith.constant 0 : index
    %41 = vector.load %arg8[%c0_28, %c0_29] : memref<30x20xbf16, #tpu.memory_space<vmem>>, vector<30x20xbf16>
    %cst_30 = arith.constant dense<0.000000e+00> : vector<30x1024xf32>
    %42 = tpu.matmul %41, %39, %cst_30 {dimension_numbers = #tpu.dot_dimension_numbers<[1], [0], [0], [1], [0, 0, 1, 1], [], []>} : vector<30x20xbf16>, vector<20x1024xbf16>, vector<30x1024xf32> -> vector<30x1024xf32>
    %43 = vector.broadcast %40 : vector<30x1xf32> to vector<30x1024xf32>
    %44 = arith.addf %42, %43 : vector<30x1024xf32>
    %cst_31 = arith.constant 0.000000e+00 : f32
    %45 = vector.broadcast %cst_31 : f32 to vector<30x1024xf32>
    %46 = arith.maximumf %44, %45 : vector<30x1024xf32>
    %47 = arith.truncf %46 : vector<30x1024xf32> to vector<30x1024xbf16>
    %c160 = arith.constant 160 : index
    %c0_32 = arith.constant 0 : index
    %48 = vector.load %arg2[%c160, %c0_32] : memref<216x1xf32, #tpu.memory_space<vmem>>, vector<40x1xf32>
    %c0_33 = arith.constant 0 : index
    %c0_34 = arith.constant 0 : index
    %49 = vector.load %arg9[%c0_33, %c0_34] : memref<40x30xbf16, #tpu.memory_space<vmem>>, vector<40x30xbf16>
    %cst_35 = arith.constant dense<0.000000e+00> : vector<40x1024xf32>
    %50 = tpu.matmul %49, %47, %cst_35 {dimension_numbers = #tpu.dot_dimension_numbers<[1], [0], [0], [1], [0, 0, 1, 1], [], []>} : vector<40x30xbf16>, vector<30x1024xbf16>, vector<40x1024xf32> -> vector<40x1024xf32>
    %51 = vector.broadcast %48 : vector<40x1xf32> to vector<40x1024xf32>
    %52 = arith.addf %50, %51 : vector<40x1024xf32>
    %cst_36 = arith.constant 0.000000e+00 : f32
    %53 = vector.broadcast %cst_36 : f32 to vector<40x1024xf32>
    %54 = arith.maximumf %52, %53 : vector<40x1024xf32>
    %55 = arith.truncf %54 : vector<40x1024xf32> to vector<40x1024xbf16>
    %c200 = arith.constant 200 : index
    %c0_37 = arith.constant 0 : index
    %56 = vector.load %arg2[%c200, %c0_37] : memref<216x1xf32, #tpu.memory_space<vmem>>, vector<16x1xf32>
    %c0_38 = arith.constant 0 : index
    %c0_39 = arith.constant 0 : index
    %57 = vector.load %arg10[%c0_38, %c0_39] : memref<16x40xbf16, #tpu.memory_space<vmem>>, vector<16x40xbf16>
    %cst_40 = arith.constant dense<0.000000e+00> : vector<16x1024xf32>
    %58 = tpu.matmul %57, %55, %cst_40 {dimension_numbers = #tpu.dot_dimension_numbers<[1], [0], [0], [1], [0, 0, 1, 1], [], []>} : vector<16x40xbf16>, vector<40x1024xbf16>, vector<16x1024xf32> -> vector<16x1024xf32>
    %59 = vector.broadcast %56 : vector<16x1xf32> to vector<16x1024xf32>
    %60 = arith.addf %58, %59 : vector<16x1024xf32>
    %c0_41 = arith.constant 0 : index
    %c0_42 = arith.constant 0 : index
    %61 = vector.load %arg12[%c0_41, %c0_42] : memref<16x1024xf32, #tpu.memory_space<vmem>>, vector<16x1024xf32>
    tpu.vector_store %arg12[%c0_41, %c0_42], %60 {strides = array<i32>} : memref<16x1024xf32, #tpu.memory_space<vmem>>, vector<16x1024xf32>,
    return
  }
  func.func @transform_0(%arg0: i32) -> (i32, i32) {
    %c0_i32 = arith.constant 0 : i32
    %c0_i32_0 = arith.constant 0 : i32
    return %c0_i32, %arg0 : i32, i32
  }
  func.func @transform_1(%arg0: i32) -> (i32, i32) {
    %c0_i32 = arith.constant 0 : i32
    %c0_i32_0 = arith.constant 0 : i32
    %c0_i32_1 = arith.constant 0 : i32
    return %c0_i32, %c0_i32_0 : i32, i32
  }
  func.func @transform_2(%arg0: i32) -> (i32, i32) {
    %c0_i32 = arith.constant 0 : i32
    %c0_i32_0 = arith.constant 0 : i32
    %c0_i32_1 = arith.constant 0 : i32
    return %c0_i32, %c0_i32_0 : i32, i32
  }
  func.func @transform_3(%arg0: i32) -> (i32, i32) {
    %c0_i32 = arith.constant 0 : i32
    %c0_i32_0 = arith.constant 0 : i32
    %c0_i32_1 = arith.constant 0 : i32
    return %c0_i32, %c0_i32_0 : i32, i32
  }
  func.func @transform_4(%arg0: i32) -> (i32, i32) {
    %c0_i32 = arith.constant 0 : i32
    %c0_i32_0 = arith.constant 0 : i32
    %c0_i32_1 = arith.constant 0 : i32
    return %c0_i32, %c0_i32_0 : i32, i32
  }
  func.func @transform_5(%arg0: i32) -> (i32, i32) {
    %c0_i32 = arith.constant 0 : i32
    %c0_i32_0 = arith.constant 0 : i32
    %c0_i32_1 = arith.constant 0 : i32
    return %c0_i32, %c0_i32_0 : i32, i32
  }
  func.func @transform_6(%arg0: i32) -> (i32, i32) {
    %c0_i32 = arith.constant 0 : i32
    %c0_i32_0 = arith.constant 0 : i32
    %c0_i32_1 = arith.constant 0 : i32
    return %c0_i32, %c0_i32_0 : i32, i32
  }
  func.func @transform_7(%arg0: i32) -> (i32, i32) {
    %c0_i32 = arith.constant 0 : i32
    %c0_i32_0 = arith.constant 0 : i32
    %c0_i32_1 = arith.constant 0 : i32
    return %c0_i32, %c0_i32_0 : i32, i32
  }
  func.func @transform_8(%arg0: i32) -> (i32, i32) {
    %c0_i32 = arith.constant 0 : i32
    %c0_i32_0 = arith.constant 0 : i32
    %c0_i32_1 = arith.constant 0 : i32
    return %c0_i32, %c0_i32_0 : i32, i32
  }
  func.func @transform_9(%arg0: i32) -> (i32, i32) {
    %c0_i32 = arith.constant 0 : i32
    %c0_i32_0 = arith.constant 0 : i32
    %c0_i32_1 = arith.constant 0 : i32
    return %c0_i32, %c0_i32_0 : i32, i32
  }
  func.func @transform_10(%arg0: i32) -> (i32, i32) {
    %c0_i32 = arith.constant 0 : i32
    %c0_i32_0 = arith.constant 0 : i32
    return %c0_i32, %arg0 : i32, i32
  }
  func.func @transform_11(%arg0: i32) -> (i32, i32) {
    %c0_i32 = arith.constant 0 : i32
    %c0_i32_0 = arith.constant 0 : i32
    return %c0_i32, %arg0 : i32, i32
  }
}

</mosaic_0001>

<bundles_post_ra>
// kernel: autoencoder_forward.1
= control target key start
LH: loop header
LB: loop body
LE: loop exit
PB: predicated region body
PF: predicated region fallthrough
CT: control target
= control target key end

     0   :  { %s4238_s0 = inlined_call_operand.vmem [shape: bf16[16,2048], index: 0, kind: input, shape index: {}]   ;;  %s4239_s1 = inlined_call_operand.vmem [shape: f32[216,1], index: 1, kind: input, shape index: {}]   ;;  %s4240_s2 = inlined_call_operand.vmem [shape: bf16[40,16], index: 2, kind: input, shape index: {}]   ;;  %s4241_s3 = inlined_call_operand.vmem [shape: bf16[30,40], index: 3, kind: input, shape index: {}]   ;;  %s4242_s4 = inlined_call_operand.vmem [shape: bf16[20,30], index: 4, kind: input, shape index: {}]   ;;  %s4243_s5 = inlined_call_operand.vmem [shape: bf16[8,20], index: 5, kind: input, shape index: {}]   ;;  %s4244_s6 = inlined_call_operand.vmem [shape: bf16[20,8], index: 6, kind: input, shape index: {}]   ;;  %s4245_s7 = inlined_call_operand.vmem [shape: bf16[30,20], index: 7, kind: input, shape index: {}]   ;;  %s4246_s8 = inlined_call_operand.vmem [shape: bf16[40,30], index: 8, kind: input, shape index: {}]   ;;  %s4247_s9 = inlined_call_operand.vmem [shape: bf16[16,40], index: 9, kind: input, shape index: {}]   ;;  %s4248_s10 = inlined_call_operand.hbm [shape: f32[8,2048], index: 10, kind: output, shape index: {0}]   ;;  %s4249_s11 = inlined_call_operand.hbm [shape: f32[16,2048], index: 11, kind: output, shape index: {1}]  }
   0x1   :  { %4252 = sst [smem:[#allocation9_spill]] %s4238_s0 }
   0x2   :  { %4253 = sst [smem:[#allocation10_spill]] %s4239_s1 }
   0x3   :  { %17 = vsyncpa [#allocation4], 0 }
   0x4   :  { %19 = vsyncpa [#allocation4 + $0x1], 0 }
   0x5   :  { %20 = vsyncpa [#allocation6], 0 }
   0x6   :  { %22 = vsyncpa [#allocation6 + $0x1], 0  ;;  %s3450_s17 = smov 0   ;;  %s3452_s18 = smov 0  }
   0x7   :  { %s3454_s19 = smov 0   ;;  %s3456_s20 = smov 0  }
   0x8 LB: > { %s4250_s21 = sadd.s32 4294967295, %s3382_s20   ;;  %s3087_s22 = sadd.s32 4294967294, %s3382_s20   ;;  %s3382_s20 = sphi %s3456_s20, %s4263_s20   ;;  %s3378_s19 = sphi %s3454_s19, %s4262_s19   ;;  %s3374_s18 = sphi %s3452_s18, %s4261_s18   ;;  %s3370_s17 = sphi %s3450_s17, %s4260_s17  }
   0x9   : > { %s3473_s23 = sadd.s32 1, %s3382_s20   ;;  %s35_s24 = sadd.s32 1, %s3378_s19 }
   0xa   : > { %s32_s25 = ssub.s32 %s3382_s20, %s3473_s23  ;;  %p42_p0 = scmp.ne.s32.totalorder %s3378_s19, %s3374_s18 }
   0xb   : > { %p33_p1 = scmp.eq.s32.totalorder %s32_s25, 0  ;;  %p43_p2 = scmp.eq.s32.totalorder %s3382_s20, 0 }
   0xc   : > { %p261_p3 = scmp.eq.s32.totalorder %s4250_s21, 1  ;;  %p266_p4 = scmp.ne.s32.totalorder %s3374_s18, %s3370_s17 }
   0xd   : > { %s3486_s26 = scalar_select %p33_p1, %s3378_s19, %s35_s24  }
   0xe   : > { %p44_p5 = por %p43_p2, %p42_p0  ;;  %p3488_p6 = por %p261_p3, %p42_p0 }
   0xf   : > { %p267_p7 = scmp.eq.s32.totalorder %s3087_s22, 1  ;;  %p3089_p9 = scmp.ge.s32.totalorder %s3382_s20, 2 }
  0x11   : > { %p3492_p8 = por %p267_p7, %p266_p4  ;;  %336 = sbr.rel (%p3089_p9) target bundleno = 38 (0x26), region = 52 }
  0x18   : > { %339 = sbr.rel (!%p44_p5) target bundleno = 38 (0x26), region = 56  ;;  %s341_s29 = sand.u32 (%p44_p5), 1, %s3378_s19  }
  0x19   : > { %s3220_s30 = sshll.u32 (%p44_p5), %s3382_s20, 5  ;;  %s3090_s12 = sshll.u32 (%p44_p5), %s341_s29, 6 }
  0x1a   : > { %s4256_s0 = sld [smem:[#allocation9_spill]] (%p44_p5)  ;;  %s343_s16 = scalar_lea.vmem (%p44_p5), [#allocation2], %s3090_s12 }
  0x20   : > { %s346_s15 = scalar_lea.vmem %s4256_s0, %s3220_s30 }
  0x21   : > { %v359_v0 = vld [vmem:[%s346_s15] sm:$0xff]  ;;  %v361_v1 = vld [vmem:[%s346_s15 + $0x8] sm:$0xff]  ;;  %v363_v2 = vld [vmem:[%s346_s15 + $0x10] sm:$0xff] }
  0x22   : > { %360 = vst [vmem:[%s343_s16] sm:$0xff] %v359_v0  ;;  %362 = vst [vmem:[%s343_s16 + $0x8] sm:$0xff] %v361_v1  ;;  %v365_v3 = vld [vmem:[%s346_s15 + $0x18] sm:$0xff]  ;;  %v367_v4 = vld [vmem:[%s346_s15 + $0x40] sm:$0xff] }
  0x23   : > { %364 = vst [vmem:[%s343_s16 + $0x10] sm:$0xff] %v363_v2  ;;  %v369_v5 = vld [vmem:[%s346_s15 + $0x48] sm:$0xff]  ;;  %366 = vst [vmem:[%s343_s16 + $0x18] sm:$0xff] %v365_v3  ;;  %v371_v6 = vld [vmem:[%s346_s15 + $0x50] sm:$0xff] }
  0x24   : > { %368 = vst [vmem:[%s343_s16 + $0x20] sm:$0xff] %v367_v4  ;;  %370 = vst [vmem:[%s343_s16 + $0x28] sm:$0xff] %v369_v5  ;;  %v373_v7 = vld [vmem:[%s346_s15 + $0x58] sm:$0xff] }
  0x25   : > { %372 = vst [vmem:[%s343_s16 + $0x30] sm:$0xff] %v371_v6  ;;  %374 = vst [vmem:[%s343_s16 + $0x38] sm:$0xff] %v373_v7 }
  0x26 PF: > { %p3093_p10 = scmp.ge.s32.totalorder %s3382_s20, 1  ;;  %p379_p11 = scmp.lt.s32.totalorder %s3382_s20, 3 }
  0x28   : > { %p380_p12 = pnand %p3093_p10, %p379_p11 }
  0x29   : > { %s3507_s22 = sand.u32 (!%p380_p12), 1, %s3374_s18   ;;  %v3384_v8 = vmov (!%p380_p12), 0   ;;  %s4257_s1 = sld [smem:[#allocation10_spill]] (!%p380_p12)  ;;  %v3273_v23 = vld [vmem:[%s4240_s2] sm:$0xff] (!%p380_p12)   ;;  %vm530_vm0 = vcmask (!%p380_p12), 130048   ;;  %v3274_v31 = vld [vmem:[%s4240_s2 + $0x8] sm:$0xff] (!%p380_p12)  }
  0x2a   : > { %383 = sbr.rel (%p380_p12) target bundleno = 1937 (0x791), region = 79  ;;  %s4251_s24 = sshll.u32 (!%p380_p12), %s3507_s22, 6  ;;  %572 = vmatprep.mubr.bf16.mxu0 (!%p380_p12), %v3384_v8  ;;  %633 = vmatprep.mubr.bf16.mxu1 (!%p380_p12), %v3384_v8  ;;  %v3275_v36 = vld [vmem:[%s4240_s2 + $0x10] ss:$0 sps:$4 sm:$0xff] (!%p380_p12)   ;;  %vm893_vm1 = vcmask (!%p380_p12), 1043456   ;;  %vm886_vm2 = vcmask (!%p380_p12), 326656  }
  0x2b   : > { %3271 = vset.pattern.permute.xlu0 (!%p380_p12), %v3384_v8  ;;  %3272 = vset.pattern.permute.xlu1 (!%p380_p12), %v3384_v8  ;;  %s388_s30 = scalar_lea.vmem (!%p380_p12), [#allocation2], %s4251_s24  ;;  %vm1214_vm3 = vcmask (!%p380_p12), 1046528   ;;  %vm1207_vm4 = vcmask (!%p380_p12), 244736   ;;  %vm1494_vm5 = vcmask (!%p380_p12), 1041408   ;;  %vm1490_vm6 = vcmask (!%p380_p12), 162816   ;;  %s4258_s12 = sshll.u32 (!%p380_p12), %s3507_s22, 6 }
  0x2c   : > { %v434_v10 = vld [vmem:[%s388_s30] sm:$0xff] (!%p380_p12)  ;;  %v435_v12 = vld [vmem:[%s388_s30 + $0x8] sm:$0xff] (!%p380_p12)  ;;  %v436_v16 = vld [vmem:[%s388_s30 + $0x10] sm:$0xff] (!%p380_p12)  ;;  %s3861_s13 = scalar_lea.vmem (!%p380_p12), [#allocation3], %s4258_s12  ;;  %vm1728_vm7 = vcmask (!%p380_p12), 64512   ;;  %s2955_s21 = scalar_lea.sflag (!%p380_p12), [#allocation4], %s3507_s22 }
  0x2d   : > { %v438_v11 = vld [vmem:[%s388_s30 + $0x20] sm:$0xff] (!%p380_p12)  ;;  %v439_v14 = vld [vmem:[%s388_s30 + $0x28] sm:$0xff] (!%p380_p12)  ;;  %v440_v17 = vld [vmem:[%s388_s30 + $0x30] sm:$0xff] (!%p380_p12)  ;;  %s2974_s14 = sshll.u32 (!%p380_p12), %s3861_s13, 4  ;;  %s3385_s29 = smov (!%p380_p12), [#allocation3]   ;;  %s2975_s14 = int_to_ptr.vmem [resolvable:$true] %s2974_s14 }
  0x2e   : > { %v3101_v13 = vcombine.high (!%p380_p12), %v434_v10, %v438_v11  ;;  %v3100_v15 = vcombine.low (!%p380_p12), %v434_v10, %v438_v11  ;;  %v3103_v18 = vcombine.high (!%p380_p12), %v435_v12, %v439_v14  ;;  %v3102_v19 = vcombine.low (!%p380_p12), %v435_v12, %v439_v14  ;;  %v437_v21 = vld [vmem:[%s388_s30 + $0x18] sm:$0xff] (!%p380_p12)  ;;  %s3288_s24 = scalar_lea.vmem (!%p380_p12), %s2975_s14, 1024  ;;  %s3292_s0 = sshll.u32 (!%p380_p12), %s3385_s29, 4  ;;  %s3293_s0 = int_to_ptr.vmem [resolvable:$false] %s3292_s0 }
  0x2f   : > { %v442_v9 = vld [vmem:[%s4257_s1] sm:$0xff] (!%p380_p12)  ;;  %v3105_v20 = vcombine.high (!%p380_p12), %v436_v16, %v440_v17  ;;  %v441_v22 = vld [vmem:[%s388_s30 + $0x38] sm:$0xff] (!%p380_p12)  ;;  %v443_v25 = vld [vmem:[%s4257_s1 + $0x8] sm:$0xff] (!%p380_p12)  ;;  %v3104_v27 = vcombine.low (!%p380_p12), %v436_v16, %v440_v17  ;;  %s4259_s30 = sadd.s32 (!%p380_p12), 4294967295, %s3382_s20   ;;  %p3289_p13 = scmp.ne.s32.totalorder (!%p380_p12), %s2975_s14, %s3288_s24 }
  0x30   : > { %454 = vperm.xlu0 (!%p380_p12), %3271, %v442_v9   ;;  %540 = vmatprep.subr.bf16.mxu0 (!%p380_p12), %v3101_v13  ;;  %v3107_v24 = vcombine.high (!%p380_p12), %v437_v21, %v441_v22  ;;  %v444_v26 = vld [vmem:[%s4257_s1 + $0x10] sm:$0xff] (!%p380_p12)  ;;  %v3106_v28 = vcombine.low (!%p380_p12), %v437_v21, %v441_v22  ;;  %v446_v29 = vld [vmem:[%s4257_s1 + $0x20] sm:$0xff] (!%p380_p12)  ;;  %v445_v30 = vld [vmem:[%s4257_s1 + $0x18] sm:$0xff] (!%p380_p12)  ;;  %s4141_s12 = sshll.u32 (!%p380_p12), %s4259_s30, 10  ;;  %p3295_p2 = scmp.lt.s32.totalorder (!%p380_p12), %s2975_s14, %s3293_s0 }
  0x31   : > { %601 = vmatprep.subr.bf16.mxu1 %v3103_v18  ;;  %541 = vmatpush1.bf16.msra.mxu0 %v3100_v15  ;;  %v849_v32 = vld [vmem:[%s4257_s1 + $0x30] sm:$0xff]  ;;  %v848_v33 = vld [vmem:[%s4257_s1 + $0x28] sm:$0xff]  ;;  %v851_v34 = vld [vmem:[%s4257_s1 + $0x40] sm:$0x3f]  ;;  %s4148_s25 = scalar_lea.hbm %s4248_s10, %s4141_s12  ;;  %p3290_p0 = pnand %p3289_p13, %p3488_p6 }
  0x32   : > { %602 = vmatpush1.bf16.msra.mxu1 %v3102_v19  ;;  %662 = vmatprep.subr.bf16.mxu0 %v3105_v20  ;;  %v850_v35 = vld [vmem:[%s4257_s1 + $0x38] sm:$0xff]  ;;  %v1179_v37 = vld [vmem:[%s4257_s1 + $0x50] sm:$0xff]  ;;  %v1178_v38 = vld [vmem:[%s4257_s1 + $0x48] sm:$0xff] }
  0x33   : > { %723 = vmatprep.subr.bf16.mxu1 %v3107_v24  ;;  %464 = vperm.xlu1 %3272, %v444_v26   ;;  %v1483_v39 = vld [vmem:[%s4257_s1 + $0x60] sm:$0xff]  ;;  %v1180_v40 = vld [vmem:[%s4257_s1 + $0x58] sm:$0xf]  ;;  %v1700_v41 = vld [vmem:[%s4257_s1 + $0x70] sm:$0xff]  ;;  %p3291_p1 = pneg %p3290_p0 }
  0x34   : > { %459 = vperm.xlu0 %3271, %v443_v25   ;;  %3108 = vmatmul.mubr.msk.bf16.vlgmr.msra.gmra.mrb[0].mxu0 %vm530_vm0, %v3273_v23  ;;  %v1699_v42 = vld [vmem:[%s4257_s1 + $0x68] sm:$0xff]  ;;  %v2003_v43 = vld [vmem:[%s4257_s1 + $0x80] sm:$0xff]  ;;  %v1701_v44 = vld [vmem:[%s4257_s1 + $0x78] sm:$0xf] }
  0x35   : > { %3111 = vmatmul.mubr.msk.bf16.vlgmr.msra.gmra.mrb[0].mxu1 %vm530_vm0, %v3273_v23  ;;  %582 = vmatprep.mubr.bf16.mxu0 %v3384_v8  ;;  %v2005_v45 = vld [vmem:[%s4257_s1 + $0x90] sm:$0xff]  ;;  %v2004_v46 = vld [vmem:[%s4257_s1 + $0x88] sm:$0xff]  ;;  %v2331_v47 = vld [vmem:[%s4257_s1 + $0xa0] sm:$0xff] }
  0x36   : > { %643 = vmatprep.mubr.bf16.mxu1 %v3384_v8  ;;  %663 = vmatpush1.bf16.msra.mxu0 %v3104_v27  ;;  %v2006_v48 = vld [vmem:[%s4257_s1 + $0x98] sm:$0x3f]  ;;  %v2333_v49 = vld [vmem:[%s4257_s1 + $0xb0] sm:$0xff]  ;;  %v2332_v50 = vld [vmem:[%s4257_s1 + $0xa8] sm:$0xff] }
  0x37   : > { %724 = vmatpush1.bf16.msra.mxu1 %v3106_v28  ;;  %469 = vperm.xlu1 %3272, %v445_v30   ;;  %v2335_v51 = vld [vmem:[%s4257_s1 + $0xc0] sm:$0xff]  ;;  %v2334_v52 = vld [vmem:[%s4257_s1 + $0xb8] sm:$0xff]  ;;  %v2721_v53 = vld [vmem:[%s4257_s1 + $0xd0] sm:$0xff] }
  0x38   : > { %474 = vperm.xlu0 %3271, %v446_v29   ;;  %v2720_v54 = vld [vmem:[%s4257_s1 + $0xc8] sm:$0xff]  ;;  %s3294_s1 = scalar_lea.vmem %s3293_s0, 2048 }
  0x39   : > { %p3296_p3 = scmp.lt.s32.totalorder %s3294_s1, %s3288_s24 }
  0x3b   : > { %858 = vperm.xlu1 %3272, %v848_v33   ;;  %p3297_p4 = por %p3296_p3, %p3295_p2 }
  0x3c   : > { %863 = vperm.xlu0 %3271, %v849_v32   ;;  %3109 = vmatmul.mubr.msk.bf16.gmra.mrb[4].mxu0 %vm530_vm0, %v3274_v31 }
  0x3d   : > { %3112 = vmatmul.mubr.msk.bf16.gmra.mrb[4].mxu1 %vm530_vm0, %v3274_v31  ;;  %592 = vmatprep.mubr.bf16.mxu0 %v3384_v8  ;;  %p3298_p5 = pnand %p3297_p4, %p3291_p1 }
  0x3e   : > { %653 = vmatprep.mubr.bf16.mxu1 %v3384_v8 }
  0x3f   : > { %868 = vperm.xlu1 %3272, %v850_v35  }
  0x40   : > { %873 = vperm.xlu0 %3271, %v851_v34  }
  0x43   : > { %1186 = vperm.xlu1 %3272, %v1178_v38  }
  0x44   : > { %1191 = vperm.xlu0 %3271, %v1179_v37   ;;  %3110 = vmatmul.mubr.msk.bf16.gmra.mrb[8].mxu0 %vm530_vm0, %v3275_v36 }
  0x45   : > { %3113 = vmatmul.mubr.msk.bf16.gmra.mrb[8].mxu1 %vm530_vm0, %v3275_v36  ;;  %694 = vmatprep.mubr.bf16.mxu0 %v3384_v8 }
  0x46   : > { %755 = vmatprep.mubr.bf16.mxu1 %v3384_v8 }
  0x47   : > { %1196 = vperm.xlu1 %3272, %v1180_v40  }
  0x48   : > { %1487 = vperm.xlu0 %3271, %v1483_v39  }
  0x4b   : > { %1707 = vperm.xlu1 %3272, %v1699_v42  }
  0x4c   : > { %1712 = vperm.xlu0 %3271, %v1700_v41   ;;  %3114 = vmatmul.mubr.msk.bf16.vlgmr.msra.gmra.mrb[12].mxu0 %vm530_vm0, %v3273_v23 }
  0x4d   : > { %3117 = vmatmul.mubr.msk.bf16.vlgmr.msra.gmra.mrb[12].mxu1 %vm530_vm0, %v3273_v23  ;;  %704 = vmatprep.mubr.bf16.mxu0 %v3384_v8 }
  0x4e   : > { %765 = vmatprep.mubr.bf16.mxu1 %v3384_v8 }
  0x4f   : > { %1717 = vperm.xlu1 %3272, %v1701_v44  }
  0x50   : > { %2013 = vperm.xlu0 %3271, %v2003_v43  }
  0x53   : > { %2018 = vperm.xlu1 %3272, %v2004_v46  }
  0x54   : > { %2023 = vperm.xlu0 %3271, %v2005_v45   ;;  %3115 = vmatmul.mubr.msk.bf16.gmra.mrb[16].mxu0 %vm530_vm0, %v3274_v31 }
  0x55   : > { %3118 = vmatmul.mubr.msk.bf16.gmra.mrb[16].mxu1 %vm530_vm0, %v3274_v31  ;;  %714 = vmatprep.mubr.bf16.mxu0 %v3384_v8 }
  0x56   : > { %775 = vmatprep.mubr.bf16.mxu1 %v3384_v8 }
  0x57   : > { %2028 = vperm.xlu1 %3272, %v2006_v48  }
  0x58   : > { %2343 = vperm.xlu0 %3271, %v2331_v47  }
  0x5b   : > { %2348 = vperm.xlu1 %3272, %v2332_v50  }
  0x5c   : > { %2353 = vperm.xlu0 %3271, %v2333_v49   ;;  %3116 = vmatmul.mubr.msk.bf16.gmra.mrb[20].mxu0 %vm530_vm0, %v3275_v36 }
  0x5d   : > { %3119 = vmatmul.mubr.msk.bf16.gmra.mrb[20].mxu1 %vm530_vm0, %v3275_v36  ;;  %950 = vmatprep.mubr.bf16.mxu0 %v3384_v8 }
  0x5e   : > { %1003 = vmatprep.mubr.bf16.mxu1 %v3384_v8 }
  0x5f   : > { %2358 = vperm.xlu1 %3272, %v2334_v52  }
  0x60   : > { %2363 = vperm.xlu0 %3271, %v2335_v51  }
  0x63   : > { %2726 = vperm.xlu1 %3272, %v2720_v54  }
  0x64   : > { %2731 = vperm.xlu0 %3271, %v2721_v53  }
  0xaf   : > { %v3630_v55 = vpop.permute.xlu0 %454 }
  0xb2   : > { %v3634_v57 = vpop.permute.xlu1 %464 }
  0xb3   : > { %v3632_v56 = vpop.permute.xlu0 %459 }
  0xb6   : > { %v3644_v20 = vpop.permute.xlu1 %469 }
  0xb7   : > { %v3654_v49 = vpop.permute.xlu0 %474 }
 0x107   : > { %v574_v58 = vpop.f32.mrb[0].mxu0 }
 0x108   : > { %v575_v59 = vadd.f32 %v574_v58, %v3630_v55  ;;  %v635_v60 = vpop.f32.mrb[0].mxu1  ;;  %v576_v61 = vpop.f32.mrb[1].mxu0 }
 0x109   : > { %v636_v62 = vadd.f32 %v635_v60, %v3630_v55  ;;  %v577_v63 = vadd.f32 %v576_v61, %v3630_v55  ;;  %v637_v0 = vpop.f32.mrb[1].mxu1  ;;  %v578_v1 = vpop.f32.mrb[2].mxu0 }
 0x10a   : > { %v638_v2 = vadd.f32 %v637_v0, %v3630_v55  ;;  %v579_v3 = vadd.f32 %v578_v1, %v3632_v56  ;;  %v639_v4 = vpop.f32.mrb[2].mxu1  ;;  %v580_v5 = vpop.f32.mrb[3].mxu0  ;;  %v784_v10 = vmax.f32 %v575_v59, 0.0 }
 0x10b   : > { %v640_v6 = vadd.f32 %v639_v4, %v3632_v56  ;;  %v581_v7 = vadd.f32 %v580_v5, %v3632_v56  ;;  %v641_v9 = vpop.f32.mrb[3].mxu1  ;;  %v786_v13 = vmax.f32 %v636_v62, 0.0  ;;  %v785_v14 = vmax.f32 %v577_v63, 0.0 }
 0x10c   : > { %v792_v11 = vmax.f32 %v579_v3, 0.0  ;;  %v642_v12 = vadd.f32 %v641_v9, %v3632_v56  ;;  %v787_v17 = vmax.f32 %v638_v2, 0.0 }
 0x10d   : > { %v794_v15 = vmax.f32 %v640_v6, 0.0  ;;  %v793_v16 = vmax.f32 %v581_v7, 0.0 }
 0x10e   : > { %v824_v18 = vpack.c.bf16 %v792_v11, %v784_v10  ;;  %v795_v19 = vmax.f32 %v642_v12, 0.0 }
 0x10f   : > { %v826_v21 = vpack.c.bf16 %v794_v15, %v786_v13  ;;  %v825_v22 = vpack.c.bf16 %v793_v16, %v785_v14  ;;  %v584_v23 = vpop.f32.mrb[4].mxu0  ;;  %v3666_v16 = vld [vmem:[%s4241_s3] sm:$0xff]  }
 0x110   : > { %v827_v24 = vpack.c.bf16 %v795_v19, %v787_v17  ;;  %v585_v25 = vadd.f32 %v584_v23, %v3634_v57  ;;  %v645_v26 = vpop.f32.mrb[4].mxu1  ;;  %v586_v27 = vpop.f32.mrb[5].mxu0 }
 0x111   : > { %v646_v28 = vadd.f32 %v645_v26, %v3634_v57  ;;  %v587_v29 = vadd.f32 %v586_v27, %v3634_v57  ;;  %v647_v30 = vpop.f32.mrb[5].mxu1  ;;  %v588_v31 = vpop.f32.mrb[6].mxu0  ;;  %918 = vmatprep.subr.bf16.mxu0 %v825_v22 }
 0x112   : > { %v648_v32 = vadd.f32 %v647_v30, %v3634_v57  ;;  %v589_v33 = vadd.f32 %v588_v31, %v3644_v20  ;;  %v649_v34 = vpop.f32.mrb[6].mxu1  ;;  %971 = vmatprep.subr.bf16.mxu1 %v827_v24  ;;  %v590_v35 = vpop.f32.mrb[7].mxu0  ;;  %919 = vmatpush1.bf16.msra.mxu0 %v824_v18  ;;  %v800_v39 = vmax.f32 %v585_v25, 0.0 }
 0x113   : > { %v650_v36 = vadd.f32 %v649_v34, %v3644_v20  ;;  %v591_v37 = vadd.f32 %v590_v35, %v3644_v20  ;;  %v651_v38 = vpop.f32.mrb[7].mxu1  ;;  %972 = vmatpush1.bf16.msra.mxu1 %v826_v21  ;;  %v802_v42 = vmax.f32 %v646_v28, 0.0  ;;  %v801_v43 = vmax.f32 %v587_v29, 0.0 }
 0x114   : > { %v808_v40 = vmax.f32 %v589_v33, 0.0  ;;  %v652_v41 = vadd.f32 %v651_v38, %v3644_v20  ;;  %v803_v46 = vmax.f32 %v648_v32, 0.0 }
 0x115   : > { %v810_v44 = vmax.f32 %v650_v36, 0.0  ;;  %v809_v45 = vmax.f32 %v591_v37, 0.0 }
 0x116   : > { %v832_v47 = vpack.c.bf16 %v808_v40, %v800_v39  ;;  %v811_v48 = vmax.f32 %v652_v41, 0.0 }
 0x117   : > { %v834_v50 = vpack.c.bf16 %v810_v44, %v802_v42  ;;  %v833_v51 = vpack.c.bf16 %v809_v45, %v801_v43  ;;  %v594_v52 = vpop.f32.mrb[8].mxu0 }
 0x118   : > { %v835_v53 = vpack.c.bf16 %v811_v48, %v803_v46  ;;  %v595_v54 = vadd.f32 %v594_v52, %v3654_v49  ;;  %v655_v58 = vpop.f32.mrb[8].mxu1  ;;  %v596_v59 = vpop.f32.mrb[9].mxu0 }
 0x119   : > { %v656_v60 = vadd.f32 %v655_v58, %v3654_v49  ;;  %v597_v61 = vadd.f32 %v596_v59, %v3654_v49  ;;  %v657_v62 = vpop.f32.mrb[9].mxu1  ;;  %v598_v63 = vpop.f32.mrb[10].mxu0  ;;  %920 = vmatprep.subr.bf16.mxu0 %v833_v51 }
 0x11a   : > { %v816_v0 = vmax.f32 %v595_v54, 0.0  ;;  %v658_v1 = vadd.f32 %v657_v62, %v3654_v49  ;;  %v659_v2 = vpop.f32.mrb[10].mxu1  ;;  %973 = vmatprep.subr.bf16.mxu1 %v835_v53  ;;  %v599_v3 = vpop.f32.mrb[11].mxu0  ;;  %921 = vmatpush1.bf16.msra.mxu0 %v832_v47 }
 0x11b   : > { %v818_v4 = vmax.f32 %v656_v60, 0.0  ;;  %v817_v5 = vmax.f32 %v597_v61, 0.0  ;;  %v660_v6 = vpop.f32.mrb[11].mxu1  ;;  %974 = vmatpush1.bf16.msra.mxu1 %v834_v50 }
 0x11c   : > { %v840_v7 = vpack.c.bf16 %v816_v0, %v816_v0  ;;  %v819_v9 = vmax.f32 %v658_v1, 0.0 }
 0x11d   : > { %v842_v10 = vpack.c.bf16 %v818_v4, %v818_v4  ;;  %v841_v11 = vpack.c.bf16 %v817_v5, %v817_v5 }
 0x11e   : > { %v843_v12 = vpack.c.bf16 %v819_v9, %v819_v9  ;;  %v895_v13 = vsel %vm893_vm1, %v840_v7, 0 }
 0x11f   : > { %v696_v14 = vpop.f32.mrb[12].mxu0  ;;  %3122 = vmatprep.subr.msk.bf16.mxu0 %vm893_vm1, %v841_v11  ;;  %v901_v15 = vsel %vm893_vm1, %v842_v10, 0 }
 0x120   : > { %v697_v17 = vadd.f32 %v696_v14, %v3630_v55  ;;  %v757_v18 = vpop.f32.mrb[12].mxu1  ;;  %3125 = vmatprep.subr.msk.bf16.mxu1 %vm893_vm1, %v843_v12  ;;  %v698_v19 = vpop.f32.mrb[13].mxu0  ;;  %923 = vmatpush1.bf16.msra.mxu0 %v895_v13 }
 0x121   : > { %v758_v21 = vadd.f32 %v757_v18, %v3630_v55  ;;  %v699_v22 = vadd.f32 %v698_v19, %v3630_v55  ;;  %v759_v23 = vpop.f32.mrb[13].mxu1  ;;  %976 = vmatpush1.bf16.msra.mxu1 %v901_v15  ;;  %v700_v24 = vpop.f32.mrb[14].mxu0 }
 0x122   : > { %v760_v25 = vadd.f32 %v759_v23, %v3630_v55  ;;  %v701_v26 = vadd.f32 %v700_v24, %v3632_v56  ;;  %v761_v27 = vpop.f32.mrb[14].mxu1  ;;  %v702_v28 = vpop.f32.mrb[15].mxu0  ;;  %v788_v32 = vmax.f32 %v697_v17, 0.0 }
 0x123   : > { %v762_v29 = vadd.f32 %v761_v27, %v3632_v56  ;;  %v703_v30 = vadd.f32 %v702_v28, %v3632_v56  ;;  %v763_v31 = vpop.f32.mrb[15].mxu1  ;;  %3123 = vmatmul.mubr.msk.bf16.vlgmr.msra.gmra.mrb[24].mxu0 %vm886_vm2, %v3666_v16  ;;  %v790_v55 = vmax.f32 %v758_v21, 0.0  ;;  %v789_v35 = vmax.f32 %v699_v22, 0.0 }
 0x124   : > { %v796_v33 = vmax.f32 %v701_v26, 0.0  ;;  %v764_v34 = vadd.f32 %v763_v31, %v3632_v56  ;;  %3126 = vmatmul.mubr.msk.bf16.vlgmr.msra.gmra.mrb[24].mxu1 %vm886_vm2, %v3666_v16  ;;  %960 = vmatprep.mubr.bf16.mxu0 %v3384_v8  ;;  %v791_v38 = vmax.f32 %v760_v25, 0.0  ;;  %v3686_v56 = vld [vmem:[%s4241_s3 + $0x8] sm:$0x7f]  }
 0x125   : > { %v798_v36 = vmax.f32 %v762_v29, 0.0  ;;  %v797_v37 = vmax.f32 %v703_v30, 0.0  ;;  %1013 = vmatprep.mubr.bf16.mxu1 %v3384_v8 }
 0x126   : > { %v828_v39 = vpack.c.bf16 %v796_v33, %v788_v32  ;;  %v799_v40 = vmax.f32 %v764_v34, 0.0 }
 0x127   : > { %v830_v41 = vpack.c.bf16 %v798_v36, %v790_v55  ;;  %v829_v42 = vpack.c.bf16 %v797_v37, %v789_v35  ;;  %v706_v43 = vpop.f32.mrb[16].mxu0  ;;  %v3724_v55 = vpop.permute.xlu1 %858 }
 0x128   : > { %v831_v44 = vpack.c.bf16 %v799_v40, %v791_v38  ;;  %v707_v45 = vadd.f32 %v706_v43, %v3634_v57  ;;  %v767_v46 = vpop.f32.mrb[16].mxu1  ;;  %v708_v47 = vpop.f32.mrb[17].mxu0 }
 0x129   : > { %v768_v48 = vadd.f32 %v767_v46, %v3634_v57  ;;  %v709_v50 = vadd.f32 %v708_v47, %v3634_v57  ;;  %v769_v51 = vpop.f32.mrb[17].mxu1  ;;  %v710_v52 = vpop.f32.mrb[18].mxu0  ;;  %1024 = vmatprep.subr.bf16.mxu0 %v829_v42 }
 0x12a   : > { %v770_v53 = vadd.f32 %v769_v51, %v3634_v57  ;;  %v711_v54 = vadd.f32 %v710_v52, %v3644_v20  ;;  %v771_v58 = vpop.f32.mrb[18].mxu1  ;;  %1077 = vmatprep.subr.bf16.mxu1 %v831_v44  ;;  %v712_v59 = vpop.f32.mrb[19].mxu0  ;;  %1025 = vmatpush1.bf16.msra.mxu0 %v828_v39  ;;  %v804_v63 = vmax.f32 %v707_v45, 0.0 }
 0x12b   : > { %v772_v60 = vadd.f32 %v771_v58, %v3644_v20  ;;  %v713_v61 = vadd.f32 %v712_v59, %v3644_v20  ;;  %v773_v62 = vpop.f32.mrb[19].mxu1  ;;  %1078 = vmatpush1.bf16.msra.mxu1 %v830_v41  ;;  %3124 = vmatmul.mubr.msk.bf16.gmra.mrb[28].mxu0 %vm886_vm2, %v3686_v56  ;;  %v806_v57 = vmax.f32 %v768_v48, 0.0  ;;  %v805_v2 = vmax.f32 %v709_v50, 0.0 }
 0x12c   : > { %v812_v0 = vmax.f32 %v711_v54, 0.0  ;;  %v774_v1 = vadd.f32 %v773_v62, %v3644_v20  ;;  %3127 = vmatmul.mubr.msk.bf16.gmra.mrb[28].mxu1 %vm886_vm2, %v3686_v56  ;;  %1056 = vmatprep.mubr.bf16.mxu0 %v3384_v8  ;;  %v807_v5 = vmax.f32 %v770_v53, 0.0 }
 0x12d   : > { %v814_v3 = vmax.f32 %v772_v60, 0.0  ;;  %v813_v4 = vmax.f32 %v713_v61, 0.0  ;;  %1109 = vmatprep.mubr.bf16.mxu1 %v3384_v8 }
 0x12e   : > { %v836_v6 = vpack.c.bf16 %v812_v0, %v804_v63  ;;  %v815_v7 = vmax.f32 %v774_v1, 0.0  ;;  %v3736_v63 = vpop.permute.xlu1 %868 }
 0x12f   : > { %v838_v9 = vpack.c.bf16 %v814_v3, %v806_v57  ;;  %v837_v10 = vpack.c.bf16 %v813_v4, %v805_v2  ;;  %v716_v11 = vpop.f32.mrb[20].mxu0 }
 0x130   : > { %v839_v12 = vpack.c.bf16 %v815_v7, %v807_v5  ;;  %v717_v20 = vadd.f32 %v716_v11, %v3654_v49  ;;  %v777_v13 = vpop.f32.mrb[20].mxu1  ;;  %v718_v14 = vpop.f32.mrb[21].mxu0 }
 0x131   : > { %v778_v15 = vadd.f32 %v777_v13, %v3654_v49  ;;  %v719_v17 = vadd.f32 %v718_v14, %v3654_v49  ;;  %v779_v18 = vpop.f32.mrb[21].mxu1  ;;  %v720_v19 = vpop.f32.mrb[22].mxu0  ;;  %1026 = vmatprep.subr.bf16.mxu0 %v837_v10 }
 0x132   : > { %v820_v21 = vmax.f32 %v717_v20, 0.0  ;;  %v780_v22 = vadd.f32 %v779_v18, %v3654_v49  ;;  %v781_v23 = vpop.f32.mrb[22].mxu1  ;;  %1079 = vmatprep.subr.bf16.mxu1 %v839_v12  ;;  %v721_v24 = vpop.f32.mrb[23].mxu0  ;;  %1027 = vmatpush1.bf16.msra.mxu0 %v836_v6 }
 0x133   : > { %v822_v25 = vmax.f32 %v778_v15, 0.0  ;;  %v821_v26 = vmax.f32 %v719_v17, 0.0  ;;  %v782_v27 = vpop.f32.mrb[23].mxu1  ;;  %1080 = vmatpush1.bf16.msra.mxu1 %v838_v9  ;;  %v3722_v49 = vpop.permute.xlu0 %863 }
 0x134   : > { %v844_v28 = vpack.c.bf16 %v820_v21, %v820_v21  ;;  %v823_v29 = vmax.f32 %v780_v22, 0.0 }
 0x135   : > { %v846_v30 = vpack.c.bf16 %v822_v25, %v822_v25  ;;  %v845_v31 = vpack.c.bf16 %v821_v26, %v821_v26 }
 0x136   : > { %v847_v32 = vpack.c.bf16 %v823_v29, %v823_v29  ;;  %v907_v33 = vsel %vm893_vm1, %v844_v28, 0 }
 0x137   : > { %3128 = vmatprep.subr.msk.bf16.mxu0 %vm893_vm1, %v845_v31  ;;  %v913_v34 = vsel %vm893_vm1, %v846_v30, 0  ;;  %v3734_v59 = vpop.permute.xlu0 %873 }
 0x138   : > { %3131 = vmatprep.subr.msk.bf16.mxu1 %vm893_vm1, %v847_v32  ;;  %1029 = vmatpush1.bf16.msra.mxu0 %v907_v33 }
 0x139   : > { %1082 = vmatpush1.bf16.msra.mxu1 %v913_v34  ;;  %v3752_v34 = vld [vmem:[%s4242_s4] sm:$0xff]  }
 0x13b   : > { %3129 = vmatmul.mubr.msk.bf16.vlgmr.msra.gmra.mrb[32].mxu0 %vm886_vm2, %v3666_v16 }
 0x13c   : > { %3132 = vmatmul.mubr.msk.bf16.vlgmr.msra.gmra.mrb[32].mxu1 %vm886_vm2, %v3666_v16  ;;  %1066 = vmatprep.mubr.bf16.mxu0 %v3384_v8 }
 0x13d   : > { %1119 = vmatprep.mubr.bf16.mxu1 %v3384_v8 }
 0x143   : > { %3130 = vmatmul.mubr.msk.bf16.gmra.mrb[36].mxu0 %vm886_vm2, %v3686_v56 }
 0x144   : > { %3133 = vmatmul.mubr.msk.bf16.gmra.mrb[36].mxu1 %vm886_vm2, %v3686_v56  ;;  %1271 = vmatprep.mubr.bf16.mxu0 %v3384_v8 }
 0x145   : > { %1322 = vmatprep.mubr.bf16.mxu1 %v3384_v8 }
 0x1f6   : > { %v952_v35 = vpop.f32.mrb[24].mxu0 }
 0x1f7   : > { %v953_v16 = vadd.f32 %v952_v35, %v3724_v55  ;;  %v1005_v36 = vpop.f32.mrb[24].mxu1  ;;  %v954_v37 = vpop.f32.mrb[25].mxu0 }
 0x1f8   : > { %v1006_v38 = vadd.f32 %v1005_v36, %v3724_v55  ;;  %v955_v39 = vadd.f32 %v954_v37, %v3724_v55  ;;  %v1007_v40 = vpop.f32.mrb[25].mxu1  ;;  %v956_v41 = vpop.f32.mrb[26].mxu0 }
 0x1f9   : > { %v1008_v42 = vadd.f32 %v1007_v40, %v3724_v55  ;;  %v957_v43 = vadd.f32 %v956_v41, %v3722_v49  ;;  %v1009_v56 = vpop.f32.mrb[26].mxu1  ;;  %v958_v44 = vpop.f32.mrb[27].mxu0  ;;  %v1130_v48 = vmax.f32 %v953_v16, 0.0 }
 0x1fa   : > { %v1010_v45 = vadd.f32 %v1009_v56, %v3722_v49  ;;  %v959_v46 = vadd.f32 %v958_v44, %v3722_v49  ;;  %v1011_v47 = vpop.f32.mrb[27].mxu1  ;;  %v1132_v52 = vmax.f32 %v1006_v38, 0.0  ;;  %v1131_v53 = vmax.f32 %v955_v39, 0.0 }
 0x1fb   : > { %v1138_v50 = vmax.f32 %v957_v43, 0.0  ;;  %v1012_v51 = vadd.f32 %v1011_v47, %v3722_v49  ;;  %v1133_v60 = vmax.f32 %v1008_v42, 0.0  ;;  %v3767_v42 = vld [vmem:[%s4242_s4 + $0x8] ss:$0 sps:$4 sm:$0x33]  }
 0x1fc   : > { %v1140_v54 = vmax.f32 %v1010_v45, 0.0  ;;  %v1139_v58 = vmax.f32 %v959_v46, 0.0 }
 0x1fd   : > { %v1162_v61 = vpack.c.bf16 %v1138_v50, %v1130_v48  ;;  %v1141_v62 = vmax.f32 %v1012_v51, 0.0 }
 0x1fe   : > { %v1164_v0 = vpack.c.bf16 %v1140_v54, %v1132_v52  ;;  %v1163_v1 = vpack.c.bf16 %v1139_v58, %v1131_v53  ;;  %v962_v57 = vpop.f32.mrb[28].mxu0 }
 0x1ff   : > { %v1165_v2 = vpack.c.bf16 %v1141_v62, %v1133_v60  ;;  %v963_v3 = vadd.f32 %v962_v57, %v3736_v63  ;;  %v1015_v4 = vpop.f32.mrb[28].mxu1  ;;  %v964_v5 = vpop.f32.mrb[29].mxu0 }
 0x200   : > { %v1016_v6 = vadd.f32 %v1015_v4, %v3736_v63  ;;  %v965_v7 = vadd.f32 %v964_v5, %v3736_v63  ;;  %v1017_v9 = vpop.f32.mrb[29].mxu1  ;;  %v966_v10 = vpop.f32.mrb[30].mxu0  ;;  %1239 = vmatprep.subr.bf16.mxu0 %v1163_v1 }
 0x201   : > { %v1018_v11 = vadd.f32 %v1017_v9, %v3736_v63  ;;  %v967_v12 = vadd.f32 %v966_v10, %v3734_v59  ;;  %v1019_v20 = vpop.f32.mrb[30].mxu1  ;;  %1290 = vmatprep.subr.bf16.mxu1 %v1165_v2  ;;  %v968_v13 = vpop.f32.mrb[31].mxu0  ;;  %1240 = vmatpush1.bf16.msra.mxu0 %v1162_v61  ;;  %v1146_v18 = vmax.f32 %v963_v3, 0.0 }
 0x202   : > { %v1020_v14 = vadd.f32 %v1019_v20, %v3734_v59  ;;  %v969_v15 = vadd.f32 %v968_v13, %v3734_v59  ;;  %v1021_v17 = vpop.f32.mrb[31].mxu1  ;;  %1291 = vmatpush1.bf16.msra.mxu1 %v1164_v0  ;;  %v1148_v22 = vmax.f32 %v1016_v6, 0.0  ;;  %v1147_v23 = vmax.f32 %v965_v7, 0.0 }
 0x203   : > { %v1154_v19 = vmax.f32 %v967_v12, 0.0  ;;  %v1022_v21 = vadd.f32 %v1021_v17, %v3734_v59  ;;  %v1149_v26 = vmax.f32 %v1018_v11, 0.0 }
 0x204   : > { %v1156_v24 = vmax.f32 %v1020_v14, 0.0  ;;  %v1155_v25 = vmax.f32 %v969_v15, 0.0 }
 0x205   : > { %v1170_v27 = vpack.c.bf16 %v1154_v19, %v1146_v18  ;;  %v1157_v28 = vmax.f32 %v1022_v21, 0.0 }
 0x206   : > { %v1172_v29 = vpack.c.bf16 %v1156_v24, %v1148_v22  ;;  %v1171_v30 = vpack.c.bf16 %v1155_v25, %v1147_v23 }
 0x207   : > { %v1173_v31 = vpack.c.bf16 %v1157_v28, %v1149_v26  ;;  %v1216_v32 = vsel %vm1214_vm3, %v1170_v27, 0 }
 0x208   : > { %3136 = vmatprep.subr.msk.bf16.mxu0 %vm1214_vm3, %v1171_v30  ;;  %v1222_v33 = vsel %vm1214_vm3, %v1172_v29, 0 }
 0x209   : > { %3139 = vmatprep.subr.msk.bf16.mxu1 %vm1214_vm3, %v1173_v31  ;;  %1242 = vmatpush1.bf16.msra.mxu0 %v1216_v32  ;;  %v3806_v32 = vpop.permute.xlu1 %1186 }
 0x20a   : > { %1293 = vmatpush1.bf16.msra.mxu1 %v1222_v33 }
 0x20c   : > { %3137 = vmatmul.mubr.msk.bf16.vlgmr.msra.gmra.mrb[40].mxu0 %vm1207_vm4, %v3752_v34 }
 0x20d   : > { %3140 = vmatmul.mubr.msk.bf16.vlgmr.msra.gmra.mrb[40].mxu1 %vm1207_vm4, %v3752_v34  ;;  %1281 = vmatprep.mubr.bf16.mxu0 %v3384_v8 }
 0x20e   : > { %v1058_v35 = vpop.f32.mrb[32].mxu0  ;;  %1332 = vmatprep.mubr.bf16.mxu1 %v3384_v8 }
 0x20f   : > { %v1059_v16 = vadd.f32 %v1058_v35, %v3724_v55  ;;  %v1111_v36 = vpop.f32.mrb[32].mxu1  ;;  %v1060_v37 = vpop.f32.mrb[33].mxu0 }
 0x210   : > { %v1112_v38 = vadd.f32 %v1111_v36, %v3724_v55  ;;  %v1061_v39 = vadd.f32 %v1060_v37, %v3724_v55  ;;  %v1113_v40 = vpop.f32.mrb[33].mxu1  ;;  %v1062_v41 = vpop.f32.mrb[34].mxu0 }
 0x211   : > { %v1114_v43 = vadd.f32 %v1113_v40, %v3724_v55  ;;  %v1063_v56 = vadd.f32 %v1062_v41, %v3722_v49  ;;  %v1115_v44 = vpop.f32.mrb[34].mxu1  ;;  %v1064_v45 = vpop.f32.mrb[35].mxu0  ;;  %v1134_v50 = vmax.f32 %v1059_v16, 0.0 }
 0x212   : > { %v1116_v46 = vadd.f32 %v1115_v44, %v3722_v49  ;;  %v1065_v47 = vadd.f32 %v1064_v45, %v3722_v49  ;;  %v1117_v48 = vpop.f32.mrb[35].mxu1  ;;  %v1136_v53 = vmax.f32 %v1112_v38, 0.0  ;;  %v1135_v54 = vmax.f32 %v1061_v39, 0.0 }
 0x213   : > { %v1142_v51 = vmax.f32 %v1063_v56, 0.0  ;;  %v1118_v52 = vadd.f32 %v1117_v48, %v3722_v49  ;;  %v1137_v55 = vmax.f32 %v1114_v43, 0.0 }
 0x214   : > { %v1144_v58 = vmax.f32 %v1116_v46, 0.0  ;;  %v1143_v60 = vmax.f32 %v1065_v47, 0.0  ;;  %3138 = vmatmul.mubr.msk.bf16.gmra.mrb[44].mxu0 %vm1207_vm4, %v3767_v42 }
 0x215   : > { %v1166_v61 = vpack.c.bf16 %v1142_v51, %v1134_v50  ;;  %v1145_v62 = vmax.f32 %v1118_v52, 0.0  ;;  %3141 = vmatmul.mubr.msk.bf16.gmra.mrb[44].mxu1 %vm1207_vm4, %v3767_v42  ;;  %1373 = vmatprep.mubr.bf16.mxu0 %v3384_v8 }
 0x216   : > { %v1168_v0 = vpack.c.bf16 %v1144_v58, %v1136_v53  ;;  %v1167_v1 = vpack.c.bf16 %v1143_v60, %v1135_v54  ;;  %v1068_v57 = vpop.f32.mrb[36].mxu0  ;;  %1424 = vmatprep.mubr.bf16.mxu1 %v3384_v8 }
 0x217   : > { %v1169_v49 = vpack.c.bf16 %v1145_v62, %v1137_v55  ;;  %v1069_v2 = vadd.f32 %v1068_v57, %v3736_v63  ;;  %v1121_v3 = vpop.f32.mrb[36].mxu1  ;;  %v1070_v4 = vpop.f32.mrb[37].mxu0 }
 0x218   : > { %v1122_v5 = vadd.f32 %v1121_v3, %v3736_v63  ;;  %v1071_v6 = vadd.f32 %v1070_v4, %v3736_v63  ;;  %v1123_v7 = vpop.f32.mrb[37].mxu1  ;;  %v1072_v9 = vpop.f32.mrb[38].mxu0  ;;  %1341 = vmatprep.subr.bf16.mxu0 %v1167_v1 }
 0x219   : > { %v1124_v10 = vadd.f32 %v1123_v7, %v3736_v63  ;;  %v1073_v11 = vadd.f32 %v1072_v9, %v3734_v59  ;;  %v1125_v12 = vpop.f32.mrb[38].mxu1  ;;  %1392 = vmatprep.subr.bf16.mxu1 %v1169_v49  ;;  %v1074_v20 = vpop.f32.mrb[39].mxu0  ;;  %1342 = vmatpush1.bf16.msra.mxu0 %v1166_v61  ;;  %v1150_v17 = vmax.f32 %v1069_v2, 0.0 }
 0x21a   : > { %v1126_v13 = vadd.f32 %v1125_v12, %v3734_v59  ;;  %v1075_v14 = vadd.f32 %v1074_v20, %v3734_v59  ;;  %v1127_v15 = vpop.f32.mrb[39].mxu1  ;;  %1393 = vmatpush1.bf16.msra.mxu1 %v1168_v0  ;;  %v1152_v21 = vmax.f32 %v1122_v5, 0.0  ;;  %v1151_v22 = vmax.f32 %v1071_v6, 0.0  ;;  %v3816_v55 = vpop.permute.xlu1 %1196 }
 0x21b   : > { %v1158_v18 = vmax.f32 %v1073_v11, 0.0  ;;  %v1128_v19 = vadd.f32 %v1127_v15, %v3734_v59  ;;  %v1153_v24 = vmax.f32 %v1124_v10, 0.0  ;;  %v3804_v59 = vpop.permute.xlu0 %1191 }
 0x21c   : > { %v1160_v23 = vmax.f32 %v1126_v13, 0.0  ;;  %v1159_v63 = vmax.f32 %v1075_v14, 0.0 }
 0x21d   : > { %v1174_v25 = vpack.c.bf16 %v1158_v18, %v1150_v17  ;;  %v1161_v26 = vmax.f32 %v1128_v19, 0.0 }
 0x21e   : > { %v1176_v27 = vpack.c.bf16 %v1160_v23, %v1152_v21  ;;  %v1175_v28 = vpack.c.bf16 %v1159_v63, %v1151_v22  ;;  %v3829_v23 = vld [vmem:[%s4243_s5] sm:$0xf] }
 0x21f   : > { %v1177_v29 = vpack.c.bf16 %v1161_v26, %v1153_v24  ;;  %v1228_v30 = vsel %vm1214_vm3, %v1174_v25, 0 }
 0x220   : > { %3142 = vmatprep.subr.msk.bf16.mxu0 %vm1214_vm3, %v1175_v28  ;;  %v1234_v31 = vsel %vm1214_vm3, %v1176_v27, 0 }
 0x221   : > { %3145 = vmatprep.subr.msk.bf16.mxu1 %vm1214_vm3, %v1177_v29  ;;  %1344 = vmatpush1.bf16.msra.mxu0 %v1228_v30 }
 0x222   : > { %1395 = vmatpush1.bf16.msra.mxu1 %v1234_v31 }
 0x224   : > { %3143 = vmatmul.mubr.msk.bf16.vlgmr.msra.gmra.mrb[48].mxu0 %vm1207_vm4, %v3752_v34 }
 0x225   : > { %3146 = vmatmul.mubr.msk.bf16.vlgmr.msra.gmra.mrb[48].mxu1 %vm1207_vm4, %v3752_v34  ;;  %1383 = vmatprep.mubr.bf16.mxu0 %v3384_v8 }
 0x226   : > { %1434 = vmatprep.mubr.bf16.mxu1 %v3384_v8 }
 0x22c   : > { %3144 = vmatmul.mubr.msk.bf16.gmra.mrb[52].mxu0 %vm1207_vm4, %v3767_v42 }
 0x22d   : > { %3147 = vmatmul.mubr.msk.bf16.gmra.mrb[52].mxu1 %vm1207_vm4, %v3767_v42  ;;  %1551 = vmatprep.mubr.bf16.mxu0 %v3384_v8 }
 0x22e   : > { %1592 = vmatprep.mubr.bf16.mxu1 %v3384_v8 }
 0x2df   : > { %v1273_v33 = vpop.f32.mrb[40].mxu0 }
 0x2e0   : > { %v1274_v34 = vadd.f32 %v1273_v33, %v3806_v32  ;;  %v1324_v35 = vpop.f32.mrb[40].mxu1  ;;  %v1275_v16 = vpop.f32.mrb[41].mxu0 }
 0x2e1   : > { %v1325_v36 = vadd.f32 %v1324_v35, %v3806_v32  ;;  %v1276_v37 = vadd.f32 %v1275_v16, %v3806_v32  ;;  %v1326_v38 = vpop.f32.mrb[41].mxu1  ;;  %v1277_v39 = vpop.f32.mrb[42].mxu0 }
 0x2e2   : > { %v1327_v40 = vadd.f32 %v1326_v38, %v3806_v32  ;;  %v1278_v41 = vadd.f32 %v1277_v39, %v3804_v59  ;;  %v1328_v42 = vpop.f32.mrb[42].mxu1  ;;  %v1279_v43 = vpop.f32.mrb[43].mxu0  ;;  %v1443_v46 = vmax.f32 %v1274_v34, 0.0 }
 0x2e3   : > { %v1329_v56 = vadd.f32 %v1328_v42, %v3804_v59  ;;  %v1280_v44 = vadd.f32 %v1279_v43, %v3804_v59  ;;  %v1330_v45 = vpop.f32.mrb[43].mxu1  ;;  %v1445_v50 = vmax.f32 %v1325_v36, 0.0  ;;  %v1444_v51 = vmax.f32 %v1276_v37, 0.0 }
 0x2e4   : > { %v1451_v47 = vmax.f32 %v1278_v41, 0.0  ;;  %v1331_v48 = vadd.f32 %v1330_v45, %v3804_v59  ;;  %v1446_v54 = vmax.f32 %v1327_v40, 0.0 }
 0x2e5   : > { %v1453_v52 = vmax.f32 %v1329_v56, 0.0  ;;  %v1452_v53 = vmax.f32 %v1280_v44, 0.0 }
 0x2e6   : > { %v1467_v58 = vpack.c.bf16 %v1451_v47, %v1443_v46  ;;  %v1454_v60 = vmax.f32 %v1331_v48, 0.0 }
 0x2e7   : > { %v1469_v61 = vpack.c.bf16 %v1453_v52, %v1445_v50  ;;  %v1468_v62 = vpack.c.bf16 %v1452_v53, %v1444_v51  ;;  %v1283_v0 = vpop.f32.mrb[44].mxu0 }
 0x2e8   : > { %v1470_v1 = vpack.c.bf16 %v1454_v60, %v1446_v54  ;;  %v1284_v57 = vadd.f32 %v1283_v0, %v3816_v55  ;;  %v1334_v49 = vpop.f32.mrb[44].mxu1  ;;  %v1285_v2 = vpop.f32.mrb[45].mxu0 }
 0x2e9   : > { %v1335_v3 = vadd.f32 %v1334_v49, %v3816_v55  ;;  %v1286_v4 = vadd.f32 %v1285_v2, %v3816_v55  ;;  %v1336_v5 = vpop.f32.mrb[45].mxu1  ;;  %1519 = vmatprep.subr.bf16.mxu0 %v1468_v62  ;;  %v1287_v6 = vpop.f32.mrb[46].mxu0 }
 0x2ea   : > { %v1459_v7 = vmax.f32 %v1284_v57, 0.0  ;;  %v1337_v9 = vadd.f32 %v1336_v5, %v3816_v55  ;;  %1560 = vmatprep.subr.bf16.mxu1 %v1470_v1  ;;  %1520 = vmatpush1.bf16.msra.mxu0 %v1467_v58  ;;  %v1338_v10 = vpop.f32.mrb[46].mxu1  ;;  %v1288_v11 = vpop.f32.mrb[47].mxu0 }
 0x2eb   : > { %v1461_v12 = vmax.f32 %v1335_v3, 0.0  ;;  %v1460_v20 = vmax.f32 %v1286_v4, 0.0  ;;  %1561 = vmatpush1.bf16.msra.mxu1 %v1469_v61  ;;  %v1339_v13 = vpop.f32.mrb[47].mxu1 }
 0x2ec   : > { %v1475_v14 = vpack.c.bf16 %v1459_v7, %v1459_v7  ;;  %v1462_v15 = vmax.f32 %v1337_v9, 0.0 }
 0x2ed   : > { %v1477_v17 = vpack.c.bf16 %v1461_v12, %v1461_v12  ;;  %v1476_v18 = vpack.c.bf16 %v1460_v20, %v1460_v20 }
 0x2ee   : > { %v1478_v19 = vpack.c.bf16 %v1462_v15, %v1462_v15  ;;  %v1496_v21 = vsel %vm1494_vm5, %v1475_v14, 0 }
 0x2ef   : > { %3148 = vmatprep.subr.msk.bf16.mxu0 %vm1494_vm5, %v1476_v18  ;;  %v1502_v22 = vsel %vm1494_vm5, %v1477_v17, 0 }
 0x2f0   : > { %3150 = vmatprep.subr.msk.bf16.mxu1 %vm1494_vm5, %v1478_v19  ;;  %1522 = vmatpush1.bf16.msra.mxu0 %v1496_v21 }
 0x2f1   : > { %1563 = vmatpush1.bf16.msra.mxu1 %v1502_v22 }
 0x2f3   : > { %3149 = vmatmul.mubr.msk.bf16.vlgmr.msra.gmra.mrb[56].mxu0 %vm1490_vm6, %v3829_v23 }
 0x2f4   : > { %3151 = vmatmul.mubr.msk.bf16.vlgmr.msra.gmra.mrb[56].mxu1 %vm1490_vm6, %v3829_v23  ;;  %1633 = vmatprep.mubr.bf16.mxu0 %v3384_v8 }
 0x2f5   : > { %1674 = vmatprep.mubr.bf16.mxu1 %v3384_v8 }
 0x2f7   : > { %v1375_v63 = vpop.f32.mrb[48].mxu0 }
 0x2f8   : > { %v1376_v24 = vadd.f32 %v1375_v63, %v3806_v32  ;;  %v1426_v25 = vpop.f32.mrb[48].mxu1  ;;  %v1377_v26 = vpop.f32.mrb[49].mxu0 }
 0x2f9   : > { %v1427_v27 = vadd.f32 %v1426_v25, %v3806_v32  ;;  %v1378_v28 = vadd.f32 %v1377_v26, %v3806_v32  ;;  %v1428_v29 = vpop.f32.mrb[49].mxu1  ;;  %v1379_v30 = vpop.f32.mrb[50].mxu0 }
 0x2fa   : > { %v1429_v31 = vadd.f32 %v1428_v29, %v3806_v32  ;;  %v1380_v33 = vadd.f32 %v1379_v30, %v3804_v59  ;;  %v1430_v34 = vpop.f32.mrb[50].mxu1  ;;  %v1381_v35 = vpop.f32.mrb[51].mxu0  ;;  %v1447_v38 = vmax.f32 %v1376_v24, 0.0  ;;  %v3280_v29 = vld [vmem:[%s4244_s6] sm:$0xff]  }
 0x2fb   : > { %v1431_v16 = vadd.f32 %v1430_v34, %v3804_v59  ;;  %v1382_v36 = vadd.f32 %v1381_v35, %v3804_v59  ;;  %v1432_v37 = vpop.f32.mrb[51].mxu1  ;;  %v1449_v41 = vmax.f32 %v1427_v27, 0.0  ;;  %v1448_v42 = vmax.f32 %v1378_v28, 0.0  ;;  %v3281_v30 = vld [vmem:[%s4244_s6 + $0x8] ss:$0 sps:$4 sm:$0x33]  }
 0x2fc   : > { %v1455_v39 = vmax.f32 %v1380_v33, 0.0  ;;  %v1433_v40 = vadd.f32 %v1432_v37, %v3804_v59  ;;  %v1450_v44 = vmax.f32 %v1429_v31, 0.0 }
 0x2fd   : > { %v1457_v43 = vmax.f32 %v1431_v16, 0.0  ;;  %v1456_v56 = vmax.f32 %v1382_v36, 0.0 }
 0x2fe   : > { %v1471_v45 = vpack.c.bf16 %v1455_v39, %v1447_v38  ;;  %v1458_v32 = vmax.f32 %v1433_v40, 0.0 }
 0x2ff   : > { %v1473_v46 = vpack.c.bf16 %v1457_v43, %v1449_v41  ;;  %v1472_v47 = vpack.c.bf16 %v1456_v56, %v1448_v42  ;;  %v1385_v48 = vpop.f32.mrb[52].mxu0 }
 0x300   : > { %v1474_v50 = vpack.c.bf16 %v1458_v32, %v1450_v44  ;;  %v1386_v51 = vadd.f32 %v1385_v48, %v3816_v55  ;;  %v1436_v52 = vpop.f32.mrb[52].mxu1  ;;  %v1387_v53 = vpop.f32.mrb[53].mxu0 }
 0x301   : > { %v1437_v54 = vadd.f32 %v1436_v52, %v3816_v55  ;;  %v1388_v58 = vadd.f32 %v1387_v53, %v3816_v55  ;;  %v1438_v59 = vpop.f32.mrb[53].mxu1  ;;  %v1389_v60 = vpop.f32.mrb[54].mxu0  ;;  %1601 = vmatprep.subr.bf16.mxu0 %v1472_v47 }
 0x302   : > { %v1463_v61 = vmax.f32 %v1386_v51, 0.0  ;;  %v1439_v62 = vadd.f32 %v1438_v59, %v3816_v55  ;;  %v1440_v0 = vpop.f32.mrb[54].mxu1  ;;  %1642 = vmatprep.subr.bf16.mxu1 %v1474_v50  ;;  %v1390_v1 = vpop.f32.mrb[55].mxu0  ;;  %1602 = vmatpush1.bf16.msra.mxu0 %v1471_v45 }
 0x303   : > { %v1465_v57 = vmax.f32 %v1437_v54, 0.0  ;;  %v1464_v49 = vmax.f32 %v1388_v58, 0.0  ;;  %v1441_v2 = vpop.f32.mrb[55].mxu1  ;;  %1643 = vmatpush1.bf16.msra.mxu1 %v1473_v46  ;;  %v1488_v55 = vpop.permute.xlu0 %1487 }
 0x304   : > { %v1479_v3 = vpack.c.bf16 %v1463_v61, %v1463_v61  ;;  %v1466_v4 = vmax.f32 %v1439_v62, 0.0  ;;  %v3903_v48 = vpop.permute.xlu1 %1707 }
 0x305   : > { %v1481_v5 = vpack.c.bf16 %v1465_v57, %v1465_v57  ;;  %v1480_v6 = vpack.c.bf16 %v1464_v49, %v1464_v49 }
 0x306   : > { %v1482_v7 = vpack.c.bf16 %v1466_v4, %v1466_v4  ;;  %v1508_v9 = vsel %vm1494_vm5, %v1479_v3, 0 }
 0x307   : > { %3152 = vmatprep.subr.msk.bf16.mxu0 %vm1494_vm5, %v1480_v6  ;;  %v1514_v10 = vsel %vm1494_vm5, %v1481_v5, 0  ;;  %v3901_v47 = vpop.permute.xlu0 %1712 }
 0x308   : > { %3154 = vmatprep.subr.msk.bf16.mxu1 %vm1494_vm5, %v1482_v7  ;;  %1604 = vmatpush1.bf16.msra.mxu0 %v1508_v9 }
 0x309   : > { %1645 = vmatpush1.bf16.msra.mxu1 %v1514_v10 }
 0x30b   : > { %3153 = vmatmul.mubr.msk.bf16.vlgmr.msra.gmra.mrb[60].mxu0 %vm1490_vm6, %v3829_v23 }
 0x30c   : > { %3155 = vmatmul.mubr.msk.bf16.vlgmr.msra.gmra.mrb[60].mxu1 %vm1490_vm6, %v3829_v23  ;;  %1791 = vmatprep.mubr.bf16.mxu0 %v3384_v8 }
 0x30d   : > { %1842 = vmatprep.mubr.bf16.mxu1 %v3384_v8 }
 0x3c6   : > { %v1553_v11 = vpop.f32.mrb[56].mxu0 }
 0x3c7   : > { %v1554_v12 = vadd.f32 %v1553_v11, %v1488_v55  ;;  %v1594_v20 = vpop.f32.mrb[56].mxu1  ;;  %v1555_v13 = vpop.f32.mrb[57].mxu0 }
 0x3c8   : > { %v1595_v14 = vadd.f32 %v1594_v20, %v1488_v55  ;;  %v1556_v15 = vadd.f32 %v1555_v13, %v1488_v55  ;;  %v1596_v17 = vpop.f32.mrb[57].mxu1  ;;  %v1557_v18 = vpop.f32.mrb[58].mxu0 }
 0x3c9   : > { %1683 = vst [vmem:[%s3861_s13] sm:$0xff] %v1554_v12  ;;  %v1691_v19 = vpack.c.bf16 %v1554_v12, %v1554_v12  ;;  %v1597_v21 = vadd.f32 %v1596_v17, %v1488_v55  ;;  %v1598_v22 = vpop.f32.mrb[58].mxu1  ;;  %v1558_v23 = vpop.f32.mrb[59].mxu0 }
 0x3ca   : > { %1685 = vst [vmem:[%s3861_s13 + $0x10] sm:$0xff] %v1595_v14  ;;  %v1693_v63 = vpack.c.bf16 %v1595_v14, %v1595_v14  ;;  %1684 = vst [vmem:[%s3861_s13 + $0x8] sm:$0xff] %v1556_v15  ;;  %v1692_v24 = vpack.c.bf16 %v1556_v15, %v1556_v15  ;;  %v1599_v25 = vpop.f32.mrb[59].mxu1  ;;  %v3913_v20 = vpop.permute.xlu1 %1717 }
 0x3cb   : > { %1686 = vst [vmem:[%s3861_s13 + $0x18] sm:$0xff] %v1597_v21  ;;  %v1694_v26 = vpack.c.bf16 %v1597_v21, %v1597_v21  ;;  %v1736_v27 = vsel %vm893_vm1, %v1691_v19, 0 }
 0x3cc   : > { %3158 = vmatprep.subr.msk.bf16.mxu0 %vm893_vm1, %v1692_v24  ;;  %v1742_v28 = vsel %vm893_vm1, %v1693_v63, 0 }
 0x3cd   : > { %3161 = vmatprep.subr.msk.bf16.mxu1 %vm893_vm1, %v1694_v26  ;;  %1760 = vmatpush1.bf16.msra.mxu0 %v1736_v27 }
 0x3ce   : > { %1811 = vmatpush1.bf16.msra.mxu1 %v1742_v28 }
 0x3d0   : > { %3159 = vmatmul.mubr.msk.bf16.vlgmr.msra.gmra.mrb[64].mxu0 %vm1728_vm7, %v3280_v29 }
 0x3d1   : > { %3162 = vmatmul.mubr.msk.bf16.vlgmr.msra.gmra.mrb[64].mxu1 %vm1728_vm7, %v3280_v29  ;;  %1801 = vmatprep.mubr.bf16.mxu0 %v3384_v8 }
 0x3d2   : > { %1852 = vmatprep.mubr.bf16.mxu1 %v3384_v8 }
 0x3d8   : > { %3160 = vmatmul.mubr.msk.bf16.gmra.mrb[68].mxu0 %vm1728_vm7, %v3281_v30 }
 0x3d9   : > { %3163 = vmatmul.mubr.msk.bf16.gmra.mrb[68].mxu1 %vm1728_vm7, %v3281_v30  ;;  %1893 = vmatprep.mubr.bf16.mxu0 %v3384_v8 }
 0x3da   : > { %1944 = vmatprep.mubr.bf16.mxu1 %v3384_v8 }
 0x3de   : > { %v1635_v31 = vpop.f32.mrb[60].mxu0 }
 0x3df   : > { %v1636_v33 = vadd.f32 %v1635_v31, %v1488_v55  ;;  %v1676_v34 = vpop.f32.mrb[60].mxu1  ;;  %v1637_v35 = vpop.f32.mrb[61].mxu0 }
 0x3e0   : > { %v1677_v16 = vadd.f32 %v1676_v34, %v1488_v55  ;;  %v1638_v36 = vadd.f32 %v1637_v35, %v1488_v55  ;;  %v1678_v37 = vpop.f32.mrb[61].mxu1  ;;  %v1639_v38 = vpop.f32.mrb[62].mxu0 }
 0x3e1   : > { %1687 = vst [vmem:[%s3861_s13 + $0x20] sm:$0xff] %v1636_v33  ;;  %v1695_v39 = vpack.c.bf16 %v1636_v33, %v1636_v33  ;;  %v1679_v40 = vadd.f32 %v1678_v37, %v1488_v55  ;;  %v1680_v41 = vpop.f32.mrb[62].mxu1  ;;  %v1640_v42 = vpop.f32.mrb[63].mxu0 }
 0x3e2   : > { %1689 = vst [vmem:[%s3861_s13 + $0x30] sm:$0xff] %v1677_v16  ;;  %v1697_v43 = vpack.c.bf16 %v1677_v16, %v1677_v16  ;;  %1688 = vst [vmem:[%s3861_s13 + $0x28] sm:$0xff] %v1638_v36  ;;  %v1696_v56 = vpack.c.bf16 %v1638_v36, %v1638_v36  ;;  %v1681_v44 = vpop.f32.mrb[63].mxu1  ;;  %v3937_v41 = vld [vmem:[%s4245_s7 + $0x8] sm:$0x7f]  }
 0x3e3   : > { %1690 = vst [vmem:[%s3861_s13 + $0x38] sm:$0xff] %v1679_v40  ;;  %v1698_v45 = vpack.c.bf16 %v1679_v40, %v1679_v40  ;;  %v1748_v32 = vsel %vm893_vm1, %v1695_v39, 0  ;;  %v3925_v39 = vld [vmem:[%s4245_s7] sm:$0xff]  }
 0x3e4   : > { %3164 = vmatprep.subr.msk.bf16.mxu0 %vm893_vm1, %v1696_v56  ;;  %v1754_v46 = vsel %vm893_vm1, %v1697_v43, 0 }
 0x3e5   : > { %3167 = vmatprep.subr.msk.bf16.mxu1 %vm893_vm1, %v1698_v45  ;;  %1862 = vmatpush1.bf16.msra.mxu0 %v1748_v32 }
 0x3e6   : > { %1913 = vmatpush1.bf16.msra.mxu1 %v1754_v46 }
 0x3e8   : > { %3165 = vmatmul.mubr.msk.bf16.vlgmr.msra.gmra.mrb[72].mxu0 %vm1728_vm7, %v3280_v29 }
 0x3e9   : > { %3168 = vmatmul.mubr.msk.bf16.vlgmr.msra.gmra.mrb[72].mxu1 %vm1728_vm7, %v3280_v29  ;;  %1903 = vmatprep.mubr.bf16.mxu0 %v3384_v8 }
 0x3ea   : > { %1954 = vmatprep.mubr.bf16.mxu1 %v3384_v8 }
 0x3f0   : > { %3166 = vmatmul.mubr.msk.bf16.gmra.mrb[76].mxu0 %vm1728_vm7, %v3281_v30 }
 0x3f1   : > { %3169 = vmatmul.mubr.msk.bf16.gmra.mrb[76].mxu1 %vm1728_vm7, %v3281_v30  ;;  %2103 = vmatprep.mubr.bf16.mxu0 %v3384_v8 }
 0x3f2   : > { %2156 = vmatprep.mubr.bf16.mxu1 %v3384_v8 }
 0x4a3   : > { %v1793_v50 = vpop.f32.mrb[64].mxu0 }
 0x4a4   : > { %v1794_v51 = vadd.f32 %v1793_v50, %v3903_v48  ;;  %v1844_v52 = vpop.f32.mrb[64].mxu1  ;;  %v1795_v53 = vpop.f32.mrb[65].mxu0 }
 0x4a5   : > { %v1845_v54 = vadd.f32 %v1844_v52, %v3903_v48  ;;  %v1796_v58 = vadd.f32 %v1795_v53, %v3903_v48  ;;  %v1846_v59 = vpop.f32.mrb[65].mxu1  ;;  %v1797_v60 = vpop.f32.mrb[66].mxu0 }
 0x4a6   : > { %v1847_v61 = vadd.f32 %v1846_v59, %v3903_v48  ;;  %v1798_v62 = vadd.f32 %v1797_v60, %v3901_v47  ;;  %v1848_v0 = vpop.f32.mrb[66].mxu1  ;;  %v1799_v1 = vpop.f32.mrb[67].mxu0  ;;  %v1963_v3 = vmax.f32 %v1794_v51, 0.0 }
 0x4a7   : > { %v1849_v57 = vadd.f32 %v1848_v0, %v3901_v47  ;;  %v1800_v49 = vadd.f32 %v1799_v1, %v3901_v47  ;;  %v1850_v2 = vpop.f32.mrb[67].mxu1  ;;  %v1965_v6 = vmax.f32 %v1845_v54, 0.0  ;;  %v1964_v7 = vmax.f32 %v1796_v58, 0.0 }
 0x4a8   : > { %v1971_v4 = vmax.f32 %v1798_v62, 0.0  ;;  %v1851_v5 = vadd.f32 %v1850_v2, %v3901_v47  ;;  %v1966_v55 = vmax.f32 %v1847_v61, 0.0 }
 0x4a9   : > { %v1973_v9 = vmax.f32 %v1849_v57, 0.0  ;;  %v1972_v10 = vmax.f32 %v1800_v49, 0.0 }
 0x4aa   : > { %v1987_v11 = vpack.c.bf16 %v1971_v4, %v1963_v3  ;;  %v1974_v12 = vmax.f32 %v1851_v5, 0.0 }
 0x4ab   : > { %v1989_v13 = vpack.c.bf16 %v1973_v9, %v1965_v6  ;;  %v1988_v14 = vpack.c.bf16 %v1972_v10, %v1964_v7  ;;  %v1803_v15 = vpop.f32.mrb[68].mxu0 }
 0x4ac   : > { %v1990_v17 = vpack.c.bf16 %v1974_v12, %v1966_v55  ;;  %v1804_v18 = vadd.f32 %v1803_v15, %v3913_v20  ;;  %v1854_v19 = vpop.f32.mrb[68].mxu1  ;;  %v1805_v21 = vpop.f32.mrb[69].mxu0 }
 0x4ad   : > { %v1855_v22 = vadd.f32 %v1854_v19, %v3913_v20  ;;  %v1806_v23 = vadd.f32 %v1805_v21, %v3913_v20  ;;  %v1856_v63 = vpop.f32.mrb[69].mxu1  ;;  %2071 = vmatprep.subr.bf16.mxu0 %v1988_v14  ;;  %v1807_v24 = vpop.f32.mrb[70].mxu0 }
 0x4ae   : > { %v1979_v25 = vmax.f32 %v1804_v18, 0.0  ;;  %v1857_v26 = vadd.f32 %v1856_v63, %v3913_v20  ;;  %2124 = vmatprep.subr.bf16.mxu1 %v1990_v17  ;;  %2072 = vmatpush1.bf16.msra.mxu0 %v1987_v11  ;;  %v1858_v27 = vpop.f32.mrb[70].mxu1  ;;  %v1808_v28 = vpop.f32.mrb[71].mxu0 }
 0x4af   : > { %v1981_v29 = vmax.f32 %v1855_v22, 0.0  ;;  %v1980_v30 = vmax.f32 %v1806_v23, 0.0  ;;  %2125 = vmatpush1.bf16.msra.mxu1 %v1989_v13  ;;  %v1859_v31 = vpop.f32.mrb[71].mxu1 }
 0x4b0   : > { %v1995_v33 = vpack.c.bf16 %v1979_v25, %v1979_v25  ;;  %v1982_v34 = vmax.f32 %v1857_v26, 0.0 }
 0x4b1   : > { %v1997_v35 = vpack.c.bf16 %v1981_v29, %v1981_v29  ;;  %v1996_v16 = vpack.c.bf16 %v1980_v30, %v1980_v30  ;;  %v3975_v29 = vpop.permute.xlu1 %2018 }
 0x4b2   : > { %v1998_v36 = vpack.c.bf16 %v1982_v34, %v1982_v34  ;;  %v2048_v37 = vsel %vm1494_vm5, %v1995_v33, 0 }
 0x4b3   : > { %3172 = vmatprep.subr.msk.bf16.mxu0 %vm1494_vm5, %v1996_v16  ;;  %v2054_v38 = vsel %vm1494_vm5, %v1997_v35, 0 }
 0x4b4   : > { %3175 = vmatprep.subr.msk.bf16.mxu1 %vm1494_vm5, %v1998_v36  ;;  %2074 = vmatpush1.bf16.msra.mxu0 %v2048_v37 }
 0x4b5   : > { %2127 = vmatpush1.bf16.msra.mxu1 %v2054_v38 }
 0x4b7   : > { %3173 = vmatmul.mubr.msk.bf16.vlgmr.msra.gmra.mrb[80].mxu0 %vm1490_vm6, %v3925_v39 }
 0x4b8   : > { %3176 = vmatmul.mubr.msk.bf16.vlgmr.msra.gmra.mrb[80].mxu1 %vm1490_vm6, %v3925_v39  ;;  %2113 = vmatprep.mubr.bf16.mxu0 %v3384_v8 }
 0x4b9   : > { %2166 = vmatprep.mubr.bf16.mxu1 %v3384_v8 }
 0x4bb   : > { %v1895_v40 = vpop.f32.mrb[72].mxu0 }
 0x4bc   : > { %v1896_v42 = vadd.f32 %v1895_v40, %v3903_v48  ;;  %v1946_v43 = vpop.f32.mrb[72].mxu1  ;;  %v1897_v56 = vpop.f32.mrb[73].mxu0 }
 0x4bd   : > { %v1947_v44 = vadd.f32 %v1946_v43, %v3903_v48  ;;  %v1898_v45 = vadd.f32 %v1897_v56, %v3903_v48  ;;  %v1948_v32 = vpop.f32.mrb[73].mxu1  ;;  %v1899_v46 = vpop.f32.mrb[74].mxu0 }
 0x4be   : > { %v1949_v50 = vadd.f32 %v1948_v32, %v3903_v48  ;;  %v1900_v51 = vadd.f32 %v1899_v46, %v3901_v47  ;;  %v1950_v52 = vpop.f32.mrb[74].mxu1  ;;  %v1901_v53 = vpop.f32.mrb[75].mxu0  ;;  %v1967_v60 = vmax.f32 %v1896_v42, 0.0 }
 0x4bf   : > { %v1951_v54 = vadd.f32 %v1950_v52, %v3901_v47  ;;  %v1902_v58 = vadd.f32 %v1901_v53, %v3901_v47  ;;  %v1952_v59 = vpop.f32.mrb[75].mxu1  ;;  %3174 = vmatmul.mubr.msk.bf16.gmra.mrb[84].mxu0 %vm1490_vm6, %v3937_v41  ;;  %v1969_v48 = vmax.f32 %v1947_v44, 0.0  ;;  %v1968_v0 = vmax.f32 %v1898_v45, 0.0 }
 0x4c0   : > { %v1975_v61 = vmax.f32 %v1900_v51, 0.0  ;;  %v1953_v62 = vadd.f32 %v1952_v59, %v3901_v47  ;;  %3177 = vmatmul.mubr.msk.bf16.gmra.mrb[84].mxu1 %vm1490_vm6, %v3937_v41  ;;  %2209 = vmatprep.mubr.bf16.mxu0 %v3384_v8  ;;  %v1970_v49 = vmax.f32 %v1949_v50, 0.0 }
 0x4c1   : > { %v1977_v1 = vmax.f32 %v1951_v54, 0.0  ;;  %v1976_v57 = vmax.f32 %v1902_v58, 0.0  ;;  %2262 = vmatprep.mubr.bf16.mxu1 %v3384_v8 }
 0x4c2   : > { %v1991_v2 = vpack.c.bf16 %v1975_v61, %v1967_v60  ;;  %v1978_v3 = vmax.f32 %v1953_v62, 0.0  ;;  %v3987_v60 = vpop.permute.xlu1 %2028 }
 0x4c3   : > { %v1993_v4 = vpack.c.bf16 %v1977_v1, %v1969_v48  ;;  %v1992_v5 = vpack.c.bf16 %v1976_v57, %v1968_v0  ;;  %v1905_v6 = vpop.f32.mrb[76].mxu0 }
 0x4c4   : > { %v1994_v7 = vpack.c.bf16 %v1978_v3, %v1970_v49  ;;  %v1906_v47 = vadd.f32 %v1905_v6, %v3913_v20  ;;  %v1956_v9 = vpop.f32.mrb[76].mxu1  ;;  %v1907_v10 = vpop.f32.mrb[77].mxu0 }
 0x4c5   : > { %v1957_v55 = vadd.f32 %v1956_v9, %v3913_v20  ;;  %v1908_v11 = vadd.f32 %v1907_v10, %v3913_v20  ;;  %v1958_v12 = vpop.f32.mrb[77].mxu1  ;;  %v1909_v13 = vpop.f32.mrb[78].mxu0  ;;  %2177 = vmatprep.subr.bf16.mxu0 %v1992_v5 }
 0x4c6   : > { %v1983_v14 = vmax.f32 %v1906_v47, 0.0  ;;  %v1959_v15 = vadd.f32 %v1958_v12, %v3913_v20  ;;  %v1960_v17 = vpop.f32.mrb[78].mxu1  ;;  %2230 = vmatprep.subr.bf16.mxu1 %v1994_v7  ;;  %v1910_v18 = vpop.f32.mrb[79].mxu0  ;;  %2178 = vmatpush1.bf16.msra.mxu0 %v1991_v2 }
 0x4c7   : > { %v1985_v19 = vmax.f32 %v1957_v55, 0.0  ;;  %v1984_v21 = vmax.f32 %v1908_v11, 0.0  ;;  %v1961_v22 = vpop.f32.mrb[79].mxu1  ;;  %2231 = vmatpush1.bf16.msra.mxu1 %v1993_v4  ;;  %v3973_v20 = vpop.permute.xlu0 %2013 }
 0x4c8   : > { %v1999_v23 = vpack.c.bf16 %v1983_v14, %v1983_v14  ;;  %v1986_v63 = vmax.f32 %v1959_v15, 0.0 }
 0x4c9   : > { %v2001_v24 = vpack.c.bf16 %v1985_v19, %v1985_v19  ;;  %v2000_v25 = vpack.c.bf16 %v1984_v21, %v1984_v21 }
 0x4ca   : > { %v2002_v26 = vpack.c.bf16 %v1986_v63, %v1986_v63  ;;  %v2060_v27 = vsel %vm1494_vm5, %v1999_v23, 0 }
 0x4cb   : > { %3178 = vmatprep.subr.msk.bf16.mxu0 %vm1494_vm5, %v2000_v25  ;;  %v2066_v28 = vsel %vm1494_vm5, %v2001_v24, 0  ;;  %v3985_v53 = vpop.permute.xlu0 %2023 }
 0x4cc   : > { %3181 = vmatprep.subr.msk.bf16.mxu1 %vm1494_vm5, %v2002_v26  ;;  %2180 = vmatpush1.bf16.msra.mxu0 %v2060_v27 }
 0x4cd   : > { %2233 = vmatpush1.bf16.msra.mxu1 %v2066_v28  ;;  %v4003_v28 = vld [vmem:[%s4246_s8] sm:$0xff]  }
 0x4cf   : > { %3179 = vmatmul.mubr.msk.bf16.vlgmr.msra.gmra.mrb[88].mxu0 %vm1490_vm6, %v3925_v39 }
 0x4d0   : > { %3182 = vmatmul.mubr.msk.bf16.vlgmr.msra.gmra.mrb[88].mxu1 %vm1490_vm6, %v3925_v39  ;;  %2219 = vmatprep.mubr.bf16.mxu0 %v3384_v8 }
 0x4d1   : > { %2272 = vmatprep.mubr.bf16.mxu1 %v3384_v8 }
 0x4d7   : > { %3180 = vmatmul.mubr.msk.bf16.gmra.mrb[92].mxu0 %vm1490_vm6, %v3937_v41 }
 0x4d8   : > { %3183 = vmatmul.mubr.msk.bf16.gmra.mrb[92].mxu1 %vm1490_vm6, %v3937_v41  ;;  %2444 = vmatprep.mubr.bf16.mxu0 %v3384_v8 }
 0x4d9   : > { %2505 = vmatprep.mubr.bf16.mxu1 %v3384_v8 }
 0x58a   : > { %v2105_v30 = vpop.f32.mrb[80].mxu0 }
 0x58b   : > { %v2106_v31 = vadd.f32 %v2105_v30, %v3973_v20  ;;  %v2158_v33 = vpop.f32.mrb[80].mxu1  ;;  %v2107_v34 = vpop.f32.mrb[81].mxu0 }
 0x58c   : > { %v2159_v35 = vadd.f32 %v2158_v33, %v3973_v20  ;;  %v2108_v16 = vadd.f32 %v2107_v34, %v3973_v20  ;;  %v2160_v36 = vpop.f32.mrb[81].mxu1  ;;  %v2109_v37 = vpop.f32.mrb[82].mxu0 }
 0x58d   : > { %v2161_v38 = vadd.f32 %v2160_v36, %v3973_v20  ;;  %v2110_v39 = vadd.f32 %v2109_v37, %v3975_v29  ;;  %v2162_v40 = vpop.f32.mrb[82].mxu1  ;;  %v2111_v41 = vpop.f32.mrb[83].mxu0  ;;  %v2283_v44 = vmax.f32 %v2106_v31, 0.0 }
 0x58e   : > { %v2163_v42 = vadd.f32 %v2162_v40, %v3975_v29  ;;  %v2112_v43 = vadd.f32 %v2111_v41, %v3975_v29  ;;  %v2164_v56 = vpop.f32.mrb[83].mxu1  ;;  %v2285_v46 = vmax.f32 %v2159_v35, 0.0  ;;  %v2284_v50 = vmax.f32 %v2108_v16, 0.0 }
 0x58f   : > { %v2291_v45 = vmax.f32 %v2110_v39, 0.0  ;;  %v2165_v32 = vadd.f32 %v2164_v56, %v3975_v29  ;;  %v2286_v54 = vmax.f32 %v2161_v38, 0.0  ;;  %v4018_v38 = vld [vmem:[%s4246_s8 + $0x8] sm:$0xff]  }
 0x590   : > { %v2293_v51 = vmax.f32 %v2163_v42, 0.0  ;;  %v2292_v52 = vmax.f32 %v2112_v43, 0.0 }
 0x591   : > { %v2315_v58 = vpack.c.bf16 %v2291_v45, %v2283_v44  ;;  %v2294_v59 = vmax.f32 %v2165_v32, 0.0 }
 0x592   : > { %v2317_v61 = vpack.c.bf16 %v2293_v51, %v2285_v46  ;;  %v2316_v62 = vpack.c.bf16 %v2292_v52, %v2284_v50  ;;  %v2115_v48 = vpop.f32.mrb[84].mxu0 }
 0x593   : > { %v2318_v0 = vpack.c.bf16 %v2294_v59, %v2286_v54  ;;  %v2116_v1 = vadd.f32 %v2115_v48, %v3985_v53  ;;  %v2168_v57 = vpop.f32.mrb[84].mxu1  ;;  %v2117_v49 = vpop.f32.mrb[85].mxu0 }
 0x594   : > { %v2169_v2 = vadd.f32 %v2168_v57, %v3985_v53  ;;  %v2118_v3 = vadd.f32 %v2117_v49, %v3985_v53  ;;  %v2170_v4 = vpop.f32.mrb[85].mxu1  ;;  %v2119_v5 = vpop.f32.mrb[86].mxu0  ;;  %2412 = vmatprep.subr.bf16.mxu0 %v2316_v62 }
 0x595   : > { %v2171_v6 = vadd.f32 %v2170_v4, %v3985_v53  ;;  %v2120_v7 = vadd.f32 %v2119_v5, %v3987_v60  ;;  %v2172_v47 = vpop.f32.mrb[86].mxu1  ;;  %2473 = vmatprep.subr.bf16.mxu1 %v2318_v0  ;;  %v2121_v9 = vpop.f32.mrb[87].mxu0  ;;  %2413 = vmatpush1.bf16.msra.mxu0 %v2315_v58  ;;  %v2299_v12 = vmax.f32 %v2116_v1, 0.0  ;;  %v3286_v5 = vld [vmem:[%s4246_s8 + $0x10] ss:$0 sps:$4 sm:$0xff]  }
 0x596   : > { %v2173_v10 = vadd.f32 %v2172_v47, %v3987_v60  ;;  %v2122_v55 = vadd.f32 %v2121_v9, %v3987_v60  ;;  %v2174_v11 = vpop.f32.mrb[87].mxu1  ;;  %2474 = vmatpush1.bf16.msra.mxu1 %v2317_v61  ;;  %v2301_v15 = vmax.f32 %v2169_v2, 0.0  ;;  %v2300_v17 = vmax.f32 %v2118_v3, 0.0 }
 0x597   : > { %v2307_v13 = vmax.f32 %v2120_v7, 0.0  ;;  %v2175_v14 = vadd.f32 %v2174_v11, %v3987_v60  ;;  %v2302_v21 = vmax.f32 %v2171_v6, 0.0 }
 0x598   : > { %v2309_v18 = vmax.f32 %v2173_v10, 0.0  ;;  %v2308_v19 = vmax.f32 %v2122_v55, 0.0 }
 0x599   : > { %v2323_v22 = vpack.c.bf16 %v2307_v13, %v2299_v12  ;;  %v2310_v23 = vmax.f32 %v2175_v14, 0.0 }
 0x59a   : > { %v2325_v63 = vpack.c.bf16 %v2309_v18, %v2301_v15  ;;  %v2324_v24 = vpack.c.bf16 %v2308_v19, %v2300_v17 }
 0x59b   : > { %v2326_v25 = vpack.c.bf16 %v2310_v23, %v2302_v21  ;;  %v2389_v26 = vsel %vm1214_vm3, %v2323_v22, 0 }
 0x59c   : > { %3187 = vmatprep.subr.msk.bf16.mxu0 %vm1214_vm3, %v2324_v24  ;;  %v2395_v27 = vsel %vm1214_vm3, %v2325_v63, 0 }
 0x59d   : > { %3191 = vmatprep.subr.msk.bf16.mxu1 %vm1214_vm3, %v2326_v25  ;;  %2415 = vmatpush1.bf16.msra.mxu0 %v2389_v26  ;;  %v4066_v26 = vpop.permute.xlu0 %2343 }
 0x59e   : > { %2476 = vmatpush1.bf16.msra.mxu1 %v2395_v27  ;;  %v4068_v27 = vpop.permute.xlu1 %2348 }
 0x5a0   : > { %3188 = vmatmul.mubr.msk.bf16.vlgmr.msra.gmra.mrb[96].mxu0 %vm1207_vm4, %v4003_v28 }
 0x5a1   : > { %3192 = vmatmul.mubr.msk.bf16.vlgmr.msra.gmra.mrb[96].mxu1 %vm1207_vm4, %v4003_v28  ;;  %2454 = vmatprep.mubr.bf16.mxu0 %v3384_v8 }
 0x5a2   : > { %v2211_v30 = vpop.f32.mrb[88].mxu0  ;;  %2515 = vmatprep.mubr.bf16.mxu1 %v3384_v8 }
 0x5a3   : > { %v2212_v31 = vadd.f32 %v2211_v30, %v3973_v20  ;;  %v2264_v33 = vpop.f32.mrb[88].mxu1  ;;  %v2213_v34 = vpop.f32.mrb[89].mxu0 }
 0x5a4   : > { %v2265_v35 = vadd.f32 %v2264_v33, %v3973_v20  ;;  %v2214_v16 = vadd.f32 %v2213_v34, %v3973_v20  ;;  %v2266_v36 = vpop.f32.mrb[89].mxu1  ;;  %v2215_v37 = vpop.f32.mrb[90].mxu0 }
 0x5a5   : > { %v2267_v39 = vadd.f32 %v2266_v36, %v3973_v20  ;;  %v2216_v40 = vadd.f32 %v2215_v37, %v3975_v29  ;;  %v2268_v41 = vpop.f32.mrb[90].mxu1  ;;  %v2217_v42 = vpop.f32.mrb[91].mxu0  ;;  %v2287_v45 = vmax.f32 %v2212_v31, 0.0 }
 0x5a6   : > { %v2269_v43 = vadd.f32 %v2268_v41, %v3975_v29  ;;  %v2218_v56 = vadd.f32 %v2217_v42, %v3975_v29  ;;  %v2270_v44 = vpop.f32.mrb[91].mxu1  ;;  %v2289_v50 = vmax.f32 %v2265_v35, 0.0  ;;  %v2288_v51 = vmax.f32 %v2214_v16, 0.0 }
 0x5a7   : > { %v2295_v32 = vmax.f32 %v2216_v40, 0.0  ;;  %v2271_v46 = vadd.f32 %v2270_v44, %v3975_v29  ;;  %v2290_v20 = vmax.f32 %v2267_v39, 0.0 }
 0x5a8   : > { %v2297_v52 = vmax.f32 %v2269_v43, 0.0  ;;  %v2296_v54 = vmax.f32 %v2218_v56, 0.0  ;;  %3189 = vmatmul.mubr.msk.bf16.gmra.mrb[100].mxu0 %vm1207_vm4, %v4018_v38 }
 0x5a9   : > { %v2319_v58 = vpack.c.bf16 %v2295_v32, %v2287_v45  ;;  %v2298_v59 = vmax.f32 %v2271_v46, 0.0  ;;  %3193 = vmatmul.mubr.msk.bf16.gmra.mrb[100].mxu1 %vm1207_vm4, %v4018_v38  ;;  %2464 = vmatprep.mubr.bf16.mxu0 %v3384_v8 }
 0x5aa   : > { %v2321_v61 = vpack.c.bf16 %v2297_v52, %v2289_v50  ;;  %v2320_v62 = vpack.c.bf16 %v2296_v54, %v2288_v51  ;;  %v2221_v48 = vpop.f32.mrb[92].mxu0  ;;  %2525 = vmatprep.mubr.bf16.mxu1 %v3384_v8  ;;  %v4078_v52 = vpop.permute.xlu0 %2353 }
 0x5ab   : > { %v2322_v29 = vpack.c.bf16 %v2298_v59, %v2290_v20  ;;  %v2222_v0 = vadd.f32 %v2221_v48, %v3985_v53  ;;  %v2274_v1 = vpop.f32.mrb[92].mxu1  ;;  %v2223_v57 = vpop.f32.mrb[93].mxu0 }
 0x5ac   : > { %v2275_v49 = vadd.f32 %v2274_v1, %v3985_v53  ;;  %v2224_v2 = vadd.f32 %v2223_v57, %v3985_v53  ;;  %v2276_v3 = vpop.f32.mrb[93].mxu1  ;;  %v2225_v4 = vpop.f32.mrb[94].mxu0  ;;  %2534 = vmatprep.subr.bf16.mxu0 %v2320_v62 }
 0x5ad   : > { %v2277_v6 = vadd.f32 %v2276_v3, %v3985_v53  ;;  %v2226_v7 = vadd.f32 %v2225_v4, %v3987_v60  ;;  %v2278_v47 = vpop.f32.mrb[94].mxu1  ;;  %2595 = vmatprep.subr.bf16.mxu1 %v2322_v29  ;;  %v2227_v9 = vpop.f32.mrb[95].mxu0  ;;  %2535 = vmatpush1.bf16.msra.mxu0 %v2319_v58  ;;  %v2303_v12 = vmax.f32 %v2222_v0, 0.0 }
 0x5ae   : > { %v2279_v10 = vadd.f32 %v2278_v47, %v3987_v60  ;;  %v2228_v55 = vadd.f32 %v2227_v9, %v3987_v60  ;;  %v2280_v11 = vpop.f32.mrb[95].mxu1  ;;  %2596 = vmatpush1.bf16.msra.mxu1 %v2321_v61  ;;  %v2305_v15 = vmax.f32 %v2275_v49, 0.0  ;;  %v2304_v17 = vmax.f32 %v2224_v2, 0.0  ;;  %v4080_v59 = vpop.permute.xlu1 %2358 }
 0x5af   : > { %v2311_v13 = vmax.f32 %v2226_v7, 0.0  ;;  %v2281_v14 = vadd.f32 %v2280_v11, %v3987_v60  ;;  %v2306_v19 = vmax.f32 %v2277_v6, 0.0 }
 0x5b0   : > { %v2313_v18 = vmax.f32 %v2279_v10, 0.0  ;;  %v2312_v53 = vmax.f32 %v2228_v55, 0.0  ;;  %3190 = vmatmul.mubr.msk.bf16.gmra.mrb[104].mxu0 %vm1207_vm4, %v3286_v5 }
 0x5b1   : > { %v2327_v21 = vpack.c.bf16 %v2311_v13, %v2303_v12  ;;  %v2314_v22 = vmax.f32 %v2281_v14, 0.0  ;;  %3194 = vmatmul.mubr.msk.bf16.gmra.mrb[104].mxu1 %vm1207_vm4, %v3286_v5  ;;  %2566 = vmatprep.mubr.bf16.mxu0 %v3384_v8 }
 0x5b2   : > { %v2329_v23 = vpack.c.bf16 %v2313_v18, %v2305_v15  ;;  %v2328_v63 = vpack.c.bf16 %v2312_v53, %v2304_v17  ;;  %2627 = vmatprep.mubr.bf16.mxu1 %v3384_v8 }
 0x5b3   : > { %v2330_v24 = vpack.c.bf16 %v2314_v22, %v2306_v19  ;;  %v2401_v60 = vsel %vm1214_vm3, %v2327_v21, 0  ;;  %v4090_v22 = vpop.permute.xlu0 %2363 }
 0x5b4   : > { %3195 = vmatprep.subr.msk.bf16.mxu0 %vm1214_vm3, %v2328_v63  ;;  %v2407_v25 = vsel %vm1214_vm3, %v2329_v23, 0 }
 0x5b5   : > { %3199 = vmatprep.subr.msk.bf16.mxu1 %vm1214_vm3, %v2330_v24  ;;  %2537 = vmatpush1.bf16.msra.mxu0 %v2401_v60 }
 0x5b6   : > { %2598 = vmatpush1.bf16.msra.mxu1 %v2407_v25 }
 0x5b8   : > { %3196 = vmatmul.mubr.msk.bf16.vlgmr.msra.gmra.mrb[108].mxu0 %vm1207_vm4, %v4003_v28 }
 0x5b9   : > { %3200 = vmatmul.mubr.msk.bf16.vlgmr.msra.gmra.mrb[108].mxu1 %vm1207_vm4, %v4003_v28  ;;  %2576 = vmatprep.mubr.bf16.mxu0 %v3384_v8 }
 0x5ba   : > { %2637 = vmatprep.mubr.bf16.mxu1 %v3384_v8 }
 0x5c0   : > { %3197 = vmatmul.mubr.msk.bf16.gmra.mrb[112].mxu0 %vm1207_vm4, %v4018_v38 }
 0x5c1   : > { %3201 = vmatmul.mubr.msk.bf16.gmra.mrb[112].mxu1 %vm1207_vm4, %v4018_v38  ;;  %2586 = vmatprep.mubr.bf16.mxu0 %v3384_v8 }
 0x5c2   : > { %2647 = vmatprep.mubr.bf16.mxu1 %v3384_v8 }
 0x5c8   : > { %3198 = vmatmul.mubr.msk.bf16.gmra.mrb[116].mxu0 %vm1207_vm4, %v3286_v5 }
 0x5c9   : > { %3202 = vmatmul.mubr.msk.bf16.gmra.mrb[116].mxu1 %vm1207_vm4, %v3286_v5  ;;  %2798 = vmatprep.mubr.bf16.mxu0 %v3384_v8 }
 0x5ca   : > { %2841 = vmatprep.mubr.bf16.mxu1 %v3384_v8 }
 0x673   : > { %v2446_v28 = vpop.f32.mrb[96].mxu0 }
 0x674   : > { %v2447_v30 = vadd.f32 %v2446_v28, %v4066_v26  ;;  %v2507_v31 = vpop.f32.mrb[96].mxu1  ;;  %v2448_v33 = vpop.f32.mrb[97].mxu0 }
 0x675   : > { %v2508_v34 = vadd.f32 %v2507_v31, %v4066_v26  ;;  %v2449_v35 = vadd.f32 %v2448_v33, %v4066_v26  ;;  %v2509_v16 = vpop.f32.mrb[97].mxu1  ;;  %v2450_v36 = vpop.f32.mrb[98].mxu0 }
 0x676   : > { %v2510_v37 = vadd.f32 %v2509_v16, %v4066_v26  ;;  %v2451_v38 = vadd.f32 %v2450_v36, %v4068_v27  ;;  %v2511_v39 = vpop.f32.mrb[98].mxu1  ;;  %v2452_v40 = vpop.f32.mrb[99].mxu0  ;;  %v2656_v56 = vmax.f32 %v2447_v30, 0.0 }
 0x677   : > { %v2512_v41 = vadd.f32 %v2511_v39, %v4068_v27  ;;  %v2453_v42 = vadd.f32 %v2452_v40, %v4068_v27  ;;  %v2513_v43 = vpop.f32.mrb[99].mxu1  ;;  %v2658_v32 = vmax.f32 %v2508_v34, 0.0  ;;  %v2657_v46 = vmax.f32 %v2449_v35, 0.0 }
 0x678   : > { %v2664_v44 = vmax.f32 %v2451_v38, 0.0  ;;  %v2514_v45 = vadd.f32 %v2513_v43, %v4068_v27  ;;  %v2659_v54 = vmax.f32 %v2510_v37, 0.0 }
 0x679   : > { %v2666_v50 = vmax.f32 %v2512_v41, 0.0  ;;  %v2665_v51 = vmax.f32 %v2453_v42, 0.0 }
 0x67a   : > { %v2696_v20 = vpack.c.bf16 %v2664_v44, %v2656_v56  ;;  %v2667_v58 = vmax.f32 %v2514_v45, 0.0 }
 0x67b   : > { %v2698_v61 = vpack.c.bf16 %v2666_v50, %v2658_v32  ;;  %v2697_v62 = vpack.c.bf16 %v2665_v51, %v2657_v46  ;;  %v2456_v48 = vpop.f32.mrb[100].mxu0  ;;  %v4102_v51 = vld [vmem:[%s4247_s9] sm:$0xff]  }
 0x67c   : > { %v2699_v29 = vpack.c.bf16 %v2667_v58, %v2659_v54  ;;  %v2457_v0 = vadd.f32 %v2456_v48, %v4078_v52  ;;  %v2517_v1 = vpop.f32.mrb[100].mxu1  ;;  %v2458_v57 = vpop.f32.mrb[101].mxu0 }
 0x67d   : > { %v2518_v49 = vadd.f32 %v2517_v1, %v4078_v52  ;;  %v2459_v2 = vadd.f32 %v2458_v57, %v4078_v52  ;;  %v2519_v3 = vpop.f32.mrb[101].mxu1  ;;  %v2460_v4 = vpop.f32.mrb[102].mxu0  ;;  %2766 = vmatprep.subr.bf16.mxu0 %v2697_v62 }
 0x67e   : > { %v2520_v5 = vadd.f32 %v2519_v3, %v4078_v52  ;;  %v2461_v6 = vadd.f32 %v2460_v4, %v4080_v59  ;;  %v2521_v7 = vpop.f32.mrb[102].mxu1  ;;  %2809 = vmatprep.subr.bf16.mxu1 %v2699_v29  ;;  %v2462_v47 = vpop.f32.mrb[103].mxu0  ;;  %2767 = vmatpush1.bf16.msra.mxu0 %v2696_v20  ;;  %v2672_v11 = vmax.f32 %v2457_v0, 0.0 }
 0x67f   : > { %v2522_v9 = vadd.f32 %v2521_v7, %v4080_v59  ;;  %v2463_v10 = vadd.f32 %v2462_v47, %v4080_v59  ;;  %v2523_v55 = vpop.f32.mrb[103].mxu1  ;;  %2810 = vmatpush1.bf16.msra.mxu1 %v2698_v61  ;;  %v2674_v14 = vmax.f32 %v2518_v49, 0.0  ;;  %v2673_v15 = vmax.f32 %v2459_v2, 0.0 }
 0x680   : > { %v2680_v12 = vmax.f32 %v2461_v6, 0.0  ;;  %v2524_v13 = vadd.f32 %v2523_v55, %v4080_v59  ;;  %v2675_v53 = vmax.f32 %v2520_v5, 0.0 }
 0x681   : > { %v2682_v17 = vmax.f32 %v2522_v9, 0.0  ;;  %v2681_v18 = vmax.f32 %v2463_v10, 0.0 }
 0x682   : > { %v2704_v19 = vpack.c.bf16 %v2680_v12, %v2672_v11  ;;  %v2683_v21 = vmax.f32 %v2524_v13, 0.0 }
 0x683   : > { %v2706_v23 = vpack.c.bf16 %v2682_v17, %v2674_v14  ;;  %v2705_v63 = vpack.c.bf16 %v2681_v18, %v2673_v15  ;;  %v2466_v24 = vpop.f32.mrb[104].mxu0 }
 0x684   : > { %v2707_v60 = vpack.c.bf16 %v2683_v21, %v2675_v53  ;;  %v2467_v25 = vadd.f32 %v2466_v24, %v4090_v22  ;;  %v2527_v28 = vpop.f32.mrb[104].mxu1  ;;  %v2468_v30 = vpop.f32.mrb[105].mxu0 }
 0x685   : > { %v2528_v31 = vadd.f32 %v2527_v28, %v4090_v22  ;;  %v2469_v33 = vadd.f32 %v2468_v30, %v4090_v22  ;;  %v2529_v34 = vpop.f32.mrb[105].mxu1  ;;  %2768 = vmatprep.subr.bf16.mxu0 %v2705_v63  ;;  %v2470_v35 = vpop.f32.mrb[106].mxu0 }
 0x686   : > { %v2688_v16 = vmax.f32 %v2467_v25, 0.0  ;;  %v2530_v36 = vadd.f32 %v2529_v34, %v4090_v22  ;;  %2811 = vmatprep.subr.bf16.mxu1 %v2707_v60  ;;  %2769 = vmatpush1.bf16.msra.mxu0 %v2704_v19  ;;  %v2531_v37 = vpop.f32.mrb[106].mxu1  ;;  %v2471_v38 = vpop.f32.mrb[107].mxu0 }
 0x687   : > { %v2690_v39 = vmax.f32 %v2528_v31, 0.0  ;;  %v2689_v40 = vmax.f32 %v2469_v33, 0.0  ;;  %2812 = vmatpush1.bf16.msra.mxu1 %v2706_v23  ;;  %v2532_v41 = vpop.f32.mrb[107].mxu1 }
 0x688   : > { %v2712_v42 = vpack.c.bf16 %v2688_v16, %v2688_v16  ;;  %v2691_v43 = vmax.f32 %v2530_v36, 0.0 }
 0x689   : > { %v2714_v56 = vpack.c.bf16 %v2690_v39, %v2690_v39  ;;  %v2713_v44 = vpack.c.bf16 %v2689_v40, %v2689_v40 }
 0x68a   : > { %v2715_v45 = vpack.c.bf16 %v2691_v43, %v2691_v43  ;;  %v2743_v32 = vsel %vm893_vm1, %v2712_v42, 0 }
 0x68b   : > { %v2568_v46 = vpop.f32.mrb[108].mxu0  ;;  %3204 = vmatprep.subr.msk.bf16.mxu0 %vm893_vm1, %v2713_v44  ;;  %v2749_v50 = vsel %vm893_vm1, %v2714_v56, 0 }
 0x68c   : > { %v2569_v54 = vadd.f32 %v2568_v46, %v4066_v26  ;;  %v2629_v20 = vpop.f32.mrb[108].mxu1  ;;  %3206 = vmatprep.subr.msk.bf16.mxu1 %vm893_vm1, %v2715_v45  ;;  %v2570_v58 = vpop.f32.mrb[109].mxu0  ;;  %2771 = vmatpush1.bf16.msra.mxu0 %v2743_v32 }
 0x68d   : > { %v2630_v61 = vadd.f32 %v2629_v20, %v4066_v26  ;;  %v2571_v62 = vadd.f32 %v2570_v58, %v4066_v26  ;;  %v2631_v48 = vpop.f32.mrb[109].mxu1  ;;  %2814 = vmatpush1.bf16.msra.mxu1 %v2749_v50  ;;  %v2572_v29 = vpop.f32.mrb[110].mxu0 }
 0x68e   : > { %v2632_v0 = vadd.f32 %v2631_v48, %v4066_v26  ;;  %v2573_v1 = vadd.f32 %v2572_v29, %v4068_v27  ;;  %v2633_v57 = vpop.f32.mrb[110].mxu1  ;;  %v2574_v49 = vpop.f32.mrb[111].mxu0  ;;  %v2660_v5 = vmax.f32 %v2569_v54, 0.0 }
 0x68f   : > { %v2634_v2 = vadd.f32 %v2633_v57, %v4068_v27  ;;  %v2575_v3 = vadd.f32 %v2574_v49, %v4068_v27  ;;  %v2635_v4 = vpop.f32.mrb[111].mxu1  ;;  %3205 = vmatmul.mubr.msk.bf16.vlgmr.msra.gmra.mrb[120].mxu0 %vm886_vm2, %v4102_v51  ;;  %v2662_v26 = vmax.f32 %v2630_v61, 0.0  ;;  %v2661_v47 = vmax.f32 %v2571_v62, 0.0 }
 0x690   : > { %v2668_v6 = vmax.f32 %v2573_v1, 0.0  ;;  %v2636_v7 = vadd.f32 %v2635_v4, %v4068_v27  ;;  %3207 = vmatmul.mubr.msk.bf16.vlgmr.msra.gmra.mrb[120].mxu1 %vm886_vm2, %v4102_v51  ;;  %2884 = vmatprep.mubr.bf16.mxu0 %v3384_v8  ;;  %v2663_v55 = vmax.f32 %v2632_v0, 0.0 }
 0x691   : > { %v2670_v9 = vmax.f32 %v2634_v2, 0.0  ;;  %v2669_v10 = vmax.f32 %v2575_v3, 0.0  ;;  %2927 = vmatprep.mubr.bf16.mxu1 %v3384_v8 }
 0x692   : > { %v2700_v11 = vpack.c.bf16 %v2668_v6, %v2660_v5  ;;  %v2671_v12 = vmax.f32 %v2636_v7, 0.0 }
 0x693   : > { %v2702_v13 = vpack.c.bf16 %v2670_v9, %v2662_v26  ;;  %v2701_v14 = vpack.c.bf16 %v2669_v10, %v2661_v47  ;;  %v2578_v15 = vpop.f32.mrb[112].mxu0 }
 0x694   : > { %v2703_v17 = vpack.c.bf16 %v2671_v12, %v2663_v55  ;;  %v2579_v27 = vadd.f32 %v2578_v15, %v4078_v52  ;;  %v2639_v18 = vpop.f32.mrb[112].mxu1  ;;  %v2580_v53 = vpop.f32.mrb[113].mxu0 }
 0x695   : > { %v2640_v19 = vadd.f32 %v2639_v18, %v4078_v52  ;;  %v2581_v21 = vadd.f32 %v2580_v53, %v4078_v52  ;;  %v2641_v23 = vpop.f32.mrb[113].mxu1  ;;  %v2582_v63 = vpop.f32.mrb[114].mxu0  ;;  %2852 = vmatprep.subr.bf16.mxu0 %v2701_v14 }
 0x696   : > { %v2642_v8 = vadd.f32 %v2641_v23, %v4078_v52  ;;  %v2583_v24 = vadd.f32 %v2582_v63, %v4080_v59  ;;  %v2643_v60 = vpop.f32.mrb[114].mxu1  ;;  %2895 = vmatprep.subr.bf16.mxu1 %v2703_v17  ;;  %v2584_v25 = vpop.f32.mrb[115].mxu0  ;;  %2853 = vmatpush1.bf16.msra.mxu0 %v2700_v11  ;;  %v2676_v33 = vmax.f32 %v2579_v27, 0.0 }
 0x697   : > { %v2644_v28 = vadd.f32 %v2643_v60, %v4080_v59  ;;  %v2585_v30 = vadd.f32 %v2584_v25, %v4080_v59  ;;  %v2645_v31 = vpop.f32.mrb[115].mxu1  ;;  %2896 = vmatpush1.bf16.msra.mxu1 %v2702_v13  ;;  %v2678_v16 = vmax.f32 %v2640_v19, 0.0  ;;  %v2677_v36 = vmax.f32 %v2581_v21, 0.0 }
 0x698   : > { %v2684_v34 = vmax.f32 %v2583_v24, 0.0  ;;  %v2646_v35 = vadd.f32 %v2645_v31, %v4080_v59  ;;  %v2679_v38 = vmax.f32 %v2642_v8, 0.0 }
 0x699   : > { %v2686_v37 = vmax.f32 %v2644_v28, 0.0  ;;  %v2685_v52 = vmax.f32 %v2585_v30, 0.0 }
 0x69a   : > { %v2708_v39 = vpack.c.bf16 %v2684_v34, %v2676_v33  ;;  %v2687_v40 = vmax.f32 %v2646_v35, 0.0 }
 0x69b   : > { %v2710_v41 = vpack.c.bf16 %v2686_v37, %v2678_v16  ;;  %v2709_v42 = vpack.c.bf16 %v2685_v52, %v2677_v36  ;;  %v2588_v43 = vpop.f32.mrb[116].mxu0 }
 0x69c   : > { %v2711_v56 = vpack.c.bf16 %v2687_v40, %v2679_v38  ;;  %v2589_v44 = vadd.f32 %v2588_v43, %v4090_v22  ;;  %v2649_v45 = vpop.f32.mrb[116].mxu1  ;;  %v2590_v32 = vpop.f32.mrb[117].mxu0 }
 0x69d   : > { %v2650_v46 = vadd.f32 %v2649_v45, %v4090_v22  ;;  %v2591_v50 = vadd.f32 %v2590_v32, %v4090_v22  ;;  %v2651_v59 = vpop.f32.mrb[117].mxu1  ;;  %2854 = vmatprep.subr.bf16.mxu0 %v2709_v42  ;;  %v2592_v54 = vpop.f32.mrb[118].mxu0 }
 0x69e   : > { %v2692_v20 = vmax.f32 %v2589_v44, 0.0  ;;  %v2652_v58 = vadd.f32 %v2651_v59, %v4090_v22  ;;  %2897 = vmatprep.subr.bf16.mxu1 %v2711_v56  ;;  %2855 = vmatpush1.bf16.msra.mxu0 %v2708_v39  ;;  %v2653_v61 = vpop.f32.mrb[118].mxu1  ;;  %v2593_v62 = vpop.f32.mrb[119].mxu0 }
 0x69f   : > { %v2694_v48 = vmax.f32 %v2650_v46, 0.0  ;;  %v2693_v29 = vmax.f32 %v2591_v50, 0.0  ;;  %2898 = vmatpush1.bf16.msra.mxu1 %v2710_v41  ;;  %v2654_v0 = vpop.f32.mrb[119].mxu1 }
 0x6a0   : > { %v2716_v1 = vpack.c.bf16 %v2692_v20, %v2692_v20  ;;  %v2695_v57 = vmax.f32 %v2652_v58, 0.0 }
 0x6a1   : > { %v2718_v49 = vpack.c.bf16 %v2694_v48, %v2694_v48  ;;  %v2717_v2 = vpack.c.bf16 %v2693_v29, %v2693_v29 }
 0x6a2   : > { %v2719_v3 = vpack.c.bf16 %v2695_v57, %v2695_v57  ;;  %v2755_v4 = vsel %vm893_vm1, %v2716_v1, 0 }
 0x6a3   : > { %3208 = vmatprep.subr.msk.bf16.mxu0 %vm893_vm1, %v2717_v2  ;;  %v2761_v22 = vsel %vm893_vm1, %v2718_v49, 0 }
 0x6a4   : > { %3210 = vmatprep.subr.msk.bf16.mxu1 %vm893_vm1, %v2719_v3  ;;  %2857 = vmatpush1.bf16.msra.mxu0 %v2755_v4 }
 0x6a5   : > { %2900 = vmatpush1.bf16.msra.mxu1 %v2761_v22 }
 0x6a7   : > { %3209 = vmatmul.mubr.msk.bf16.vlgmr.msra.gmra.mrb[124].mxu0 %vm886_vm2, %v4102_v51 }
 0x6a8   : > { %3211 = vmatmul.mubr.msk.bf16.vlgmr.msra.gmra.mrb[124].mxu1 %vm886_vm2, %v4102_v51 }
 0x6a9   : > { %3301 = shalt.err (!%p3298_p5)
}
 0x6aa   : > { %s3302_s13 = scalar_lea.hbm %s4148_s25, 1024  ;;  %s3306_s16 = scalar_lea.hbm %s4248_s10, 2048 }
 0x6ab   : > { %p3303_p7 = scmp.ne.s32.totalorder %s4148_s25, %s3302_s13  ;;  %p3307_p12 = scmp.lt.u32.totalorder %s4148_s25, %s4248_s10 }
 0x6ac   : > { %p3308_p13 = scmp.lt.u32.totalorder %s3306_s16, %s3302_s13  ;;  %p3310_p1 = scmp.lt.u32.totalorder %s3302_s13, %s4148_s25 }
 0x6ad   : > { %p3304_p10 = pnand %p3303_p7, %p3488_p6 }
 0x6ae   : > { %p3309_p0 = por %p3308_p13, %p3307_p12 }
 0x6af   : > { %p3305_p11 = pneg %p3304_p10 }
 0x6b0   : > { %p3311_p2 = por %p3310_p1, %p3309_p0 }
 0x6b2   : > { %p3312_p3 = pnand %p3311_p2, %p3305_p11 }
 0x6b4   : > { %3315 = shalt.err (!%p3312_p3)
}
 0x6b5   : > { %3223 = dma.vmem_to_hbm [thread:$0]  (%p3488_p6), %s2975_s14, 1024, %s4148_s25, %s2955_s21   ;;  %v2732_v51 = vpop.permute.xlu0 %2731  ;;  %v2727_v5 = vpop.permute.xlu1 %2726 }
 0x6b6   : > { %s3096_s1 = sshll.u32 %s3507_s22, 7  ;;  %s4185_s13 = scalar_lea.hbm %s4249_s11, %s4141_s12 }
 0x6b7   : > { %s4169_s24 = scalar_lea.vmem [#allocation5], %s3096_s1  ;;  %s2960_s30 = scalar_lea.sflag [#allocation6], %s3507_s22 }
 0x6b8   : > { %s2987_s14 = sshll.u32 %s4169_s24, 4  ;;  %s3386_s15 = smov [#allocation5]   ;;  %s4189_s14 = int_to_ptr.vmem [resolvable:$true] %s2987_s14 }
 0x6b9   : > { %s3316_s12 = scalar_lea.vmem %s4189_s14, 2048  ;;  %s3320_s16 = sshll.u32 %s3386_s15, 4  ;;  %s3321_s16 = int_to_ptr.vmem [resolvable:$false] %s3320_s16 }
 0x6ba   : > { %p3317_p4 = scmp.ne.s32.totalorder %s4189_s14, %s3316_s12  ;;  %s3322_s29 = scalar_lea.vmem %s3321_s16, 4096 }
 0x6bb   : > { %p3323_p10 = scmp.lt.s32.totalorder %s4189_s14, %s3321_s16  ;;  %p3324_p11 = scmp.lt.s32.totalorder %s3322_s29, %s3316_s12 }
 0x6bc   : > { %p3318_p5 = pnand %p3317_p4, %p3488_p6 }
 0x6bd   : > { %p3325_p12 = por %p3324_p11, %p3323_p10 }
 0x6be   : > { %p3319_p7 = pneg %p3318_p5 }
 0x6c0   : > { %p3326_p13 = pnand %p3325_p12, %p3319_p7 }
 0x762   : > { %v2800_v6 = vpop.f32.mrb[120].mxu0 }
 0x763   : > { %v2801_v7 = vadd.f32 %v2800_v6, %v2727_v5  ;;  %v2843_v26 = vpop.f32.mrb[120].mxu1  ;;  %v2802_v47 = vpop.f32.mrb[121].mxu0 }
 0x764   : > { %v2844_v9 = vadd.f32 %v2843_v26, %v2727_v5  ;;  %v2803_v10 = vadd.f32 %v2802_v47, %v2727_v5  ;;  %v2845_v55 = vpop.f32.mrb[121].mxu1  ;;  %v2804_v11 = vpop.f32.mrb[122].mxu0 }
 0x765   : > { %2938 = vst [vmem:[%s4169_s24] sm:$0xff] %v2801_v7  ;;  %v2846_v12 = vadd.f32 %v2845_v55, %v2727_v5  ;;  %v2805_v13 = vadd.f32 %v2804_v11, %v2732_v51  ;;  %v2847_v14 = vpop.f32.mrb[122].mxu1  ;;  %v2806_v15 = vpop.f32.mrb[123].mxu0 }
 0x766   : > { %2940 = vst [vmem:[%s4169_s24 + $0x10] sm:$0xff] %v2844_v9  ;;  %2939 = vst [vmem:[%s4169_s24 + $0x8] sm:$0xff] %v2803_v10  ;;  %v2848_v17 = vadd.f32 %v2847_v14, %v2732_v51  ;;  %v2807_v27 = vadd.f32 %v2806_v15, %v2732_v51  ;;  %v2849_v18 = vpop.f32.mrb[123].mxu1 }
 0x767   : > { %2941 = vst [vmem:[%s4169_s24 + $0x18] sm:$0xff] %v2846_v12  ;;  %2946 = vst [vmem:[%s4169_s24 + $0x40] sm:$0xff] %v2805_v13  ;;  %v2850_v53 = vadd.f32 %v2849_v18, %v2732_v51 }
 0x768   : > { %2948 = vst [vmem:[%s4169_s24 + $0x50] sm:$0xff] %v2848_v17  ;;  %2947 = vst [vmem:[%s4169_s24 + $0x48] sm:$0xff] %v2807_v27 }
 0x769   : > { %2949 = vst [vmem:[%s4169_s24 + $0x58] sm:$0xff] %v2850_v53 }
 0x77a   : > { %v2886_v19 = vpop.f32.mrb[124].mxu0 }
 0x77b   : > { %v2887_v21 = vadd.f32 %v2886_v19, %v2727_v5  ;;  %v2929_v23 = vpop.f32.mrb[124].mxu1  ;;  %v2888_v63 = vpop.f32.mrb[125].mxu0 }
 0x77c   : > { %v2930_v8 = vadd.f32 %v2929_v23, %v2727_v5  ;;  %v2889_v24 = vadd.f32 %v2888_v63, %v2727_v5  ;;  %v2931_v60 = vpop.f32.mrb[125].mxu1  ;;  %v2890_v25 = vpop.f32.mrb[126].mxu0 }
 0x77d   : > { %2942 = vst [vmem:[%s4169_s24 + $0x20] sm:$0xff] %v2887_v21  ;;  %v2932_v28 = vadd.f32 %v2931_v60, %v2727_v5  ;;  %v2891_v30 = vadd.f32 %v2890_v25, %v2732_v51  ;;  %v2933_v31 = vpop.f32.mrb[126].mxu1  ;;  %v2892_v33 = vpop.f32.mrb[127].mxu0 }
 0x77e   : > { %2944 = vst [vmem:[%s4169_s24 + $0x30] sm:$0xff] %v2930_v8  ;;  %2943 = vst [vmem:[%s4169_s24 + $0x28] sm:$0xff] %v2889_v24  ;;  %v2934_v34 = vadd.f32 %v2933_v31, %v2732_v51  ;;  %v2893_v35 = vadd.f32 %v2892_v33, %v2732_v51  ;;  %v2935_v16 = vpop.f32.mrb[127].mxu1 }
 0x77f   : > { %2945 = vst [vmem:[%s4169_s24 + $0x38] sm:$0xff] %v2932_v28  ;;  %2950 = vst [vmem:[%s4169_s24 + $0x60] sm:$0xff] %v2891_v30  ;;  %v2936_v36 = vadd.f32 %v2935_v16, %v2732_v51 }
 0x780   : > { %2952 = vst [vmem:[%s4169_s24 + $0x70] sm:$0xff] %v2934_v34  ;;  %2951 = vst [vmem:[%s4169_s24 + $0x68] sm:$0xff] %v2893_v35 }
 0x781   : > { %2953 = vst [vmem:[%s4169_s24 + $0x78] sm:$0xff] %v2936_v36 }
 0x782   : > { %3329 = shalt.err (!%p3326_p13)
}
 0x783   : > { %s3330_s0 = scalar_lea.hbm %s4185_s13, 2048  ;;  %s3334_s25 = scalar_lea.hbm %s4249_s11, 4096 }
 0x784   : > { %p3331_p0 = scmp.ne.s32.totalorder %s4185_s13, %s3330_s0  ;;  %p3335_p3 = scmp.lt.u32.totalorder %s4185_s13, %s4249_s11 }
 0x785   : > { %p3336_p4 = scmp.lt.u32.totalorder %s3334_s25, %s3330_s0  ;;  %p3338_p7 = scmp.lt.u32.totalorder %s3330_s0, %s4185_s13 }
 0x786   : > { %p3332_p1 = pnand %p3331_p0, %p3488_p6 }
 0x787   : > { %p3337_p5 = por %p3336_p4, %p3335_p3 }
 0x788   : > { %p3333_p2 = pneg %p3332_p1 }
 0x789   : > { %p3339_p10 = por %p3338_p7, %p3337_p5 }
 0x78b   : > { %p3340_p11 = pnand %p3339_p10, %p3333_p2 }
 0x78d   : > { %3343 = shalt.err (!%p3340_p11)
}
 0x78e   : > { %s3387_s12 = smov 1024   ;;  %s3388_s16 = smov 2048  }
 0x78f   : > { %s3389_s29 = smov 64  }
 0x790   : > { %3224 = dma.vmem_to_hbm [thread:$0]  (%p3488_p6), %s4189_s14, 2048, %s4185_s13, %s2960_s30, %s3387_s12, %s3388_s16, %s3389_s29  }
 0x791 PF: > { %s3002_s1 = sand.u32 1, %s3370_s17   ;;  %p3228_p12 = pnand %p3089_p9, %p3492_p8 }
 0x792   : > { %s3003_s0 = scalar_lea.sflag [#allocation4], %s3002_s1 }
 0x793   : > { %3361 = dma.done.wait (!%p3228_p12), %s3003_s0, 1024  }
 0x794   : > { %3363 = vsyncadd (!%p3228_p12), %s3003_s0, 4294966272  ;;  %s3012_s24 = scalar_lea.sflag [#allocation6], %s3002_s1 }
 0x795   : > { %3365 = dma.done.wait (!%p3228_p12), %s3012_s24, 2048  }
 0x796   : > { %3367 = vsyncadd (!%p3228_p12), %s3012_s24, 4294965248  ;;  %p25_p6 = scmp.ge.s32.totalorder %s3473_s23, 4   ;;  %s4260_s17 = smov %s3374_s18 }
 0x797   : > { %s4261_s18 = smov %s3378_s19  ;;  %s4262_s19 = smov %s3486_s26 }
 0x798   : > { %s4263_s20 = smov %s3473_s23  ;;  %27 = sbr.rel (!%p25_p6) target bundleno = 8 (0x8), region = 140 }
 0x79f   :  { %3017 = vsyncpa [#allocation4], 1 }
 0x7a0   :  { %3019 = vsyncpa [#allocation4 + $0x1], 1 }
 0x7a1   :  { %3020 = vsyncpa [#allocation6], 1 }
 0x7a2   :  { %3022 = vsyncpa [#allocation6 + $0x1], 1 }

</bundles_post_ra>
